<compile_context>
chip_gen: v7x
topology: tpu7x:2x2x1
jax: 0.10.0
libtpu: 0.0.40
codegen_flags: <defaults>
</compile_context>

<pallas_src>
import jax
import jax.numpy as jnp
from jax.experimental import pallas as pl
from jax.experimental.pallas import tpu as pltpu

LATENT_DIMS = 2
IN_FEATURES = 784
HIDDEN = 512

K_PAD = 896          # 784 -> 7*128, lane-aligned contraction dim
LAT_PAD = 128        # each head (mu / log_sigma) padded to one full lane tile
HEAD_PAD = 2 * LAT_PAD


def _round_up(a, m):
    return (a + m - 1) // m * m


def _make_kernel(tile_b, batch):
    """Kernel closure over the batch-tile size and the true batch size."""

    def kernel(x_ref, w1_ref, b1_ref, w23_ref, b23_ref, eps_ref, z_ref, kl_ref):
        # layer 1: (TB,896)bf16 @ (896,512)bf16 -> f32 acc, + bias, ReLU
        h = jnp.dot(x_ref[...], w1_ref[...],
                    preferred_element_type=jnp.float32) + b1_ref[...]
        h = jnp.maximum(h, 0.0)

        # fused heads: (TB,512)bf16 @ (512,256)bf16 -> [ mu | log_sigma ]
        head = jnp.dot(h.astype(jnp.bfloat16), w23_ref[...],
                       preferred_element_type=jnp.float32) + b23_ref[...]
        mu = head[:, :LAT_PAD]          # (TB, 128), lanes >= LATENT_DIMS are 0
        log_sigma = head[:, LAT_PAD:]   # (TB, 128), lanes >= LATENT_DIMS are 0
        sigma = jnp.exp(log_sigma)      # padded lanes -> exp(0) = 1

        # reparameterization: padded lanes give 0 + 1 * 0 = 0 (eps padded w/ 0)
        z_ref[...] = mu + sigma * eps_ref[...]

        # KL partial for this batch tile, masked to real lanes / real rows.
        lane = jax.lax.broadcasted_iota(jnp.int32, mu.shape, 1)
        row = (jax.lax.broadcasted_iota(jnp.int32, mu.shape, 0)
               + pl.program_id(0) * tile_b)
        valid = (lane < LATENT_DIMS) & (row < batch)
        kl_terms = sigma * sigma + mu * mu - log_sigma - 0.5
        kl_ref[0, 0] = jnp.sum(jnp.where(valid, kl_terms, 0.0))

    return kernel


def vae_encoder_forward(x_nchw, params, eps):
    """VariationalEncoder forward.

    Args:
      x_nchw: (B, C, H, W) float32 with C*H*W == 784
      params: dict with w1 (784,512), b1 (1,512), w2 (512,2), b2 (1,2),
              w3 (512,2), b3 (1,2)   (weights stored as (in, out))
      eps:    (B, LATENT_DIMS) float32 standard-normal noise
    Returns:
      z  : (B, LATENT_DIMS) float32
      kl : scalar float32
    """
    B = x_nchw.shape[0]
    x_flat = x_nchw.reshape(B, -1).astype(jnp.float32)
    assert x_flat.shape[1] == IN_FEATURES

    # ---- batch tiling (TB multiple of 16 for bf16 sublane packing) ----------
    TB_MAX = 256
    b16 = _round_up(B, 16)
    if b16 <= TB_MAX:
        TB, B_pad = b16, b16
    else:
        TB, B_pad = TB_MAX, _round_up(B, TB_MAX)
    grid = B_pad // TB

    # ---- pack / pad operands: bf16 weights & input, f32 biases --------------
    x_pad = jnp.zeros((B_pad, K_PAD), jnp.bfloat16)
    x_pad = x_pad.at[:B, :IN_FEATURES].set(x_flat.astype(jnp.bfloat16))

    eps_pad = jnp.zeros((B_pad, LAT_PAD), jnp.float32)
    eps_pad = eps_pad.at[:B, :LATENT_DIMS].set(eps.astype(jnp.float32))

    w1 = jnp.zeros((K_PAD, HIDDEN), jnp.bfloat16)
    w1 = w1.at[:IN_FEATURES, :].set(params["w1"].astype(jnp.bfloat16))
    b1 = params["b1"].reshape(1, HIDDEN).astype(jnp.float32)

    w23 = jnp.zeros((HIDDEN, HEAD_PAD), jnp.bfloat16)
    w23 = w23.at[:, :LATENT_DIMS].set(params["w2"].astype(jnp.bfloat16))
    w23 = w23.at[:, LAT_PAD:LAT_PAD + LATENT_DIMS].set(
        params["w3"].astype(jnp.bfloat16))
    b23 = jnp.zeros((1, HEAD_PAD), jnp.float32)
    b23 = b23.at[:, :LATENT_DIMS].set(params["b2"].reshape(1, LATENT_DIMS))
    b23 = b23.at[:, LAT_PAD:LAT_PAD + LATENT_DIMS].set(
        params["b3"].reshape(1, LATENT_DIMS))

    kernel = _make_kernel(TB, B)

    z_pad, kl_parts = pl.pallas_call(
        kernel,
        out_shape=(
            jax.ShapeDtypeStruct((B_pad, LAT_PAD), jnp.float32),
            jax.ShapeDtypeStruct((grid, 1), jnp.float32),
        ),
        grid_spec=pltpu.PrefetchScalarGridSpec(
            num_scalar_prefetch=0,
            grid=(grid,),
            in_specs=[
                pl.BlockSpec((TB, K_PAD), lambda i: (i, 0)),         # x tile
                pl.BlockSpec((K_PAD, HIDDEN), lambda i: (0, 0)),     # w1 (resident)
                pl.BlockSpec((1, HIDDEN), lambda i: (0, 0)),         # b1
                pl.BlockSpec((HIDDEN, HEAD_PAD), lambda i: (0, 0)),  # fused w2|w3
                pl.BlockSpec((1, HEAD_PAD), lambda i: (0, 0)),       # fused b2|b3
                pl.BlockSpec((TB, LAT_PAD), lambda i: (i, 0)),       # eps tile
            ],
            out_specs=(
                pl.BlockSpec((TB, LAT_PAD), lambda i: (i, 0)),       # z (lane-dense)
                pl.BlockSpec((1, 1), lambda i: (i, 0),
                             memory_space=pltpu.MemorySpace.SMEM),   # KL partial
            ),
        ),
        compiler_params=pltpu.CompilerParams(
            dimension_semantics=("parallel",)),
    )(x_pad, w1, b1, w23, b23, eps_pad)

    z = z_pad[:B, :LATENT_DIMS]
    kl = jnp.sum(kl_parts)
    return z, kl


def init_params(key):
    """Deterministic init mimicking torch.nn.Linear (uniform(-1/sqrt(fan_in), +))."""
    k1, k2, k3, k4, k5, k6 = jax.random.split(key, 6)

    def lin(kw, kb, fan_in, fan_out):
        bound = 1.0 / jnp.sqrt(jnp.float32(fan_in))
        w = jax.random.uniform(kw, (fan_in, fan_out), jnp.float32, -bound, bound)
        b = jax.random.uniform(kb, (1, fan_out), jnp.float32, -bound, bound)
        return w, b

    w1, b1 = lin(k1, k2, IN_FEATURES, HIDDEN)
    w2, b2 = lin(k3, k4, HIDDEN, LATENT_DIMS)
    w3, b3 = lin(k5, k6, HIDDEN, LATENT_DIMS)
    return {"w1": w1, "b1": b1, "w2": w2, "b2": b2, "w3": w3, "b3": b3}


def reference_forward(x_nchw, params, eps):
    """Pure-JAX reference with the same bf16 weight/activation quantization."""
    B = x_nchw.shape[0]
    f32 = jnp.float32
    hp = jax.lax.Precision.HIGHEST

    x = x_nchw.reshape(B, -1).astype(jnp.bfloat16).astype(f32)
    w1 = params["w1"].astype(jnp.bfloat16).astype(f32)
    w2 = params["w2"].astype(jnp.bfloat16).astype(f32)
    w3 = params["w3"].astype(jnp.bfloat16).astype(f32)
    b1 = params["b1"].reshape(1, -1)
    b2 = params["b2"].reshape(1, -1)
    b3 = params["b3"].reshape(1, -1)

    h = jnp.maximum(jnp.dot(x, w1, precision=hp) + b1, 0.0)
    h = h.astype(jnp.bfloat16).astype(f32)
    mu = jnp.dot(h, w2, precision=hp) + b2
    log_sigma = jnp.dot(h, w3, precision=hp) + b3
    sigma = jnp.exp(log_sigma)
    z = mu + sigma * eps
    kl = jnp.sum(sigma ** 2 + mu ** 2 - log_sigma - 0.5)
    return z, kl


if __name__ == "__main__":
    key = jax.random.PRNGKey(0)
    k_param, k_x, k_eps = jax.random.split(key, 3)

    B = 8
    x = jax.random.normal(k_x, (B, 1, 28, 28), jnp.float32)  # NCHW, 1*28*28=784
    eps = jax.random.normal(k_eps, (B, LATENT_DIMS), jnp.float32)
    params = init_params(k_param)

    z, kl = vae_encoder_forward(x, params, eps)
    z = jax.block_until_ready(z)
    kl = jax.block_until_ready(kl)

    # correctness check against a pure-JAX reference using the same bf16 weights
    z_ref, kl_ref = reference_forward(x, params, eps)
    assert jnp.allclose(z, z_ref, atol=2e-3, rtol=2e-3), "z mismatch"
    assert jnp.allclose(kl, kl_ref, atol=5e-2, rtol=2e-3), "kl mismatch"

    print("KERNEL_OK")
</pallas_src>

<mosaic_0001>
module attributes {stable_mosaic.version = 11 : i64} {
  func.func @kernel(%arg0: i32, %arg1: memref<16x896xbf16, #tpu.memory_space<vmem>>, %arg2: memref<896x512xbf16, #tpu.memory_space<vmem>>, %arg3: memref<1x512xf32, #tpu.memory_space<vmem>>, %arg4: memref<512x256xbf16, #tpu.memory_space<vmem>>, %arg5: memref<1x256xf32, #tpu.memory_space<vmem>>, %arg6: memref<16x128xf32, #tpu.memory_space<vmem>>, %arg7: memref<16x128xf32, #tpu.memory_space<vmem>>, %arg8: memref<1x1xf32, #tpu.memory_space<smem>>) attributes {dimension_semantics = [#tpu.dimension_semantics<parallel>], iteration_bounds = array<i64: 1>, scalar_prefetch = 0 : i64, scratch_operands = 0 : i64, tpu.core_type = #tpu.core_type<tc>, window_params = [{transform_indices = @transform_0, window_bounds = array<i64: 16, 896>}, {pipeline_mode = #tpu.pipeline_mode<synchronous>, transform_indices = @transform_1, window_bounds = array<i64: 896, 512>}, {pipeline_mode = #tpu.pipeline_mode<synchronous>, transform_indices = @transform_2, window_bounds = array<i64: 1, 512>}, {pipeline_mode = #tpu.pipeline_mode<synchronous>, transform_indices = @transform_3, window_bounds = array<i64: 512, 256>}, {pipeline_mode = #tpu.pipeline_mode<synchronous>, transform_indices = @transform_4, window_bounds = array<i64: 1, 256>}, {transform_indices = @transform_5, window_bounds = array<i64: 16, 128>}, {transform_indices = @transform_6, window_bounds = array<i64: 16, 128>}, {transform_indices = @transform_7, window_bounds = array<i64: 1, 1>}]} {
    %c0 = arith.constant 0 : index
    %c0_0 = arith.constant 0 : index
    %0 = vector.load %arg1[%c0, %c0_0] : memref<16x896xbf16, #tpu.memory_space<vmem>>, vector<16x896xbf16>
    %c0_1 = arith.constant 0 : index
    %c0_2 = arith.constant 0 : index
    %1 = vector.load %arg2[%c0_1, %c0_2] : memref<896x512xbf16, #tpu.memory_space<vmem>>, vector<896x512xbf16>
    %cst = arith.constant dense<0.000000e+00> : vector<16x512xf32>
    %2 = tpu.matmul %0, %1, %cst {dimension_numbers = #tpu.dot_dimension_numbers<[1], [0], [0], [1], [0, 0, 1, 1], [], []>} : vector<16x896xbf16>, vector<896x512xbf16>, vector<16x512xf32> -> vector<16x512xf32>
    %c0_3 = arith.constant 0 : index
    %c0_4 = arith.constant 0 : index
    %3 = vector.load %arg3[%c0_3, %c0_4] : memref<1x512xf32, #tpu.memory_space<vmem>>, vector<1x512xf32>
    %4 = vector.broadcast %3 : vector<1x512xf32> to vector<16x512xf32>
    %5 = arith.addf %2, %4 : vector<16x512xf32>
    %cst_5 = arith.constant 0.000000e+00 : f32
    %6 = vector.broadcast %cst_5 : f32 to vector<16x512xf32>
    %7 = arith.maximumf %5, %6 : vector<16x512xf32>
    %8 = arith.truncf %7 : vector<16x512xf32> to vector<16x512xbf16>
    %c0_6 = arith.constant 0 : index
    %c0_7 = arith.constant 0 : index
    %9 = vector.load %arg4[%c0_6, %c0_7] : memref<512x256xbf16, #tpu.memory_space<vmem>>, vector<512x256xbf16>
    %cst_8 = arith.constant dense<0.000000e+00> : vector<16x256xf32>
    %10 = tpu.matmul %8, %9, %cst_8 {dimension_numbers = #tpu.dot_dimension_numbers<[1], [0], [0], [1], [0, 0, 1, 1], [], []>} : vector<16x512xbf16>, vector<512x256xbf16>, vector<16x256xf32> -> vector<16x256xf32>
    %c0_9 = arith.constant 0 : index
    %c0_10 = arith.constant 0 : index
    %11 = vector.load %arg5[%c0_9, %c0_10] : memref<1x256xf32, #tpu.memory_space<vmem>>, vector<1x256xf32>
    %12 = vector.broadcast %11 : vector<1x256xf32> to vector<16x256xf32>
    %13 = arith.addf %10, %12 : vector<16x256xf32>
    %14 = vector.extract_strided_slice %13 {offsets = [0, 0], sizes = [16, 128], strides = [1, 1]} : vector<16x256xf32> to vector<16x128xf32>
    %15 = vector.extract_strided_slice %13 {offsets = [0, 128], sizes = [16, 128], strides = [1, 1]} : vector<16x256xf32> to vector<16x128xf32>
    %16 = math.exp %15 : vector<16x128xf32>
    %c0_11 = arith.constant 0 : index
    %c0_12 = arith.constant 0 : index
    %17 = vector.load %arg6[%c0_11, %c0_12] : memref<16x128xf32, #tpu.memory_space<vmem>>, vector<16x128xf32>
    %18 = arith.mulf %16, %17 : vector<16x128xf32>
    %19 = arith.addf %14, %18 : vector<16x128xf32>
    %c0_13 = arith.constant 0 : index
    %c0_14 = arith.constant 0 : index
    %20 = vector.load %arg7[%c0_13, %c0_14] : memref<16x128xf32, #tpu.memory_space<vmem>>, vector<16x128xf32>
    tpu.vector_store %arg7[%c0_13, %c0_14], %19 {strides = array<i32>} : memref<16x128xf32, #tpu.memory_space<vmem>>, vector<16x128xf32>,
    %21 = tpu.iota {dimensions = array<i32: 1>} : vector<16x128xi32>
    %22 = tpu.iota {dimensions = array<i32: 0>} : vector<16x128xi32>
    %c16_i32 = arith.constant 16 : i32
    %23 = arith.muli %arg0, %c16_i32 : i32
    %24 = vector.broadcast %23 : i32 to vector<16x128xi32>
    %25 = arith.addi %22, %24 : vector<16x128xi32>
    %c2_i32 = arith.constant 2 : i32
    %26 = vector.broadcast %c2_i32 : i32 to vector<16x128xi32>
    %27 = arith.cmpi slt, %21, %26 : vector<16x128xi32>
    %c8_i32 = arith.constant 8 : i32
    %28 = vector.broadcast %c8_i32 : i32 to vector<16x128xi32>
    %29 = arith.cmpi slt, %25, %28 : vector<16x128xi32>
    %30 = arith.andi %27, %29 : vector<16x128xi1>
    %31 = arith.mulf %16, %16 : vector<16x128xf32>
    %32 = arith.mulf %14, %14 : vector<16x128xf32>
    %33 = arith.addf %31, %32 : vector<16x128xf32>
    %34 = arith.subf %33, %15 : vector<16x128xf32>
    %cst_15 = arith.constant 5.000000e-01 : f32
    %35 = vector.broadcast %cst_15 : f32 to vector<16x128xf32>
    %36 = arith.subf %34, %35 : vector<16x128xf32>
    %cst_16 = arith.constant 0.000000e+00 : f32
    %37 = vector.broadcast %cst_16 : f32 to vector<16x128xf32>
    %38 = arith.select %30, %36, %37 : vector<16x128xi1>, vector<16x128xf32>
    %39 = vector.shape_cast %38 : vector<16x128xf32> to vector<1x16x128xf32>
    %cst_17 = arith.constant dense<0.000000e+00> : vector<1xf32>
    %40 = vector.multi_reduction <add>, %39, %cst_17 [1, 2] : vector<1x16x128xf32> to vector<1xf32>
    %41 = vector.shape_cast %40 : vector<1xf32> to vector<1x1x1xf32>
    %42 = vector.extract %41[0, 0, 0] : f32 from vector<1x1x1xf32>
    %c0_18 = arith.constant 0 : index
    %c0_19 = arith.constant 0 : index
    %43 = memref.load %arg8[%c0_18, %c0_19] : memref<1x1xf32, #tpu.memory_space<smem>>
    memref.store %42, %arg8[%c0_18, %c0_19] : memref<1x1xf32, #tpu.memory_space<smem>>
    return
  }
  func.func @transform_0(%arg0: i32) -> (i32, i32) {
    %c0_i32 = arith.constant 0 : i32
    %c0_i32_0 = arith.constant 0 : i32
    return %arg0, %c0_i32 : i32, i32
  }
  func.func @transform_1(%arg0: i32) -> (i32, i32) {
    %c0_i32 = arith.constant 0 : i32
    %c0_i32_0 = arith.constant 0 : i32
    %c0_i32_1 = arith.constant 0 : i32
    return %c0_i32, %c0_i32_0 : i32, i32
  }
  func.func @transform_2(%arg0: i32) -> (i32, i32) {
    %c0_i32 = arith.constant 0 : i32
    %c0_i32_0 = arith.constant 0 : i32
    %c0_i32_1 = arith.constant 0 : i32
    return %c0_i32, %c0_i32_0 : i32, i32
  }
  func.func @transform_3(%arg0: i32) -> (i32, i32) {
    %c0_i32 = arith.constant 0 : i32
    %c0_i32_0 = arith.constant 0 : i32
    %c0_i32_1 = arith.constant 0 : i32
    return %c0_i32, %c0_i32_0 : i32, i32
  }
  func.func @transform_4(%arg0: i32) -> (i32, i32) {
    %c0_i32 = arith.constant 0 : i32
    %c0_i32_0 = arith.constant 0 : i32
    %c0_i32_1 = arith.constant 0 : i32
    return %c0_i32, %c0_i32_0 : i32, i32
  }
  func.func @transform_5(%arg0: i32) -> (i32, i32) {
    %c0_i32 = arith.constant 0 : i32
    %c0_i32_0 = arith.constant 0 : i32
    return %arg0, %c0_i32 : i32, i32
  }
  func.func @transform_6(%arg0: i32) -> (i32, i32) {
    %c0_i32 = arith.constant 0 : i32
    %c0_i32_0 = arith.constant 0 : i32
    return %arg0, %c0_i32 : i32, i32
  }
  func.func @transform_7(%arg0: i32) -> (i32, i32) {
    %c0_i32 = arith.constant 0 : i32
    %c0_i32_0 = arith.constant 0 : i32
    return %arg0, %c0_i32 : i32, i32
  }
}

</mosaic_0001>

<bundles_post_ra>
// kernel: tpu_custom_call.1
= control target key start
LH: loop header
LB: loop body
LE: loop exit
PB: predicated region body
PF: predicated region fallthrough
CT: control target
= control target key end

     0   :  { %13 = vsyncpa [#allocation3], 0  ;;  %s3534_s0 = inlined_call_operand.hbm [shape: bf16[16,896], index: 0, kind: input, shape index: {}]   ;;  %s3535_s1 = inlined_call_operand.hbm [shape: bf16[896,512], index: 1, kind: input, shape index: {}]   ;;  %s3536_s2 = inlined_call_operand.hbm [shape: f32[1,512], index: 2, kind: input, shape index: {}]   ;;  %s3537_s3 = inlined_call_operand.hbm [shape: bf16[512,256], index: 3, kind: input, shape index: {}]   ;;  %s3538_s4 = inlined_call_operand.vmem [shape: f32[1,256], index: 4, kind: input, shape index: {}]   ;;  %s3539_s5 = inlined_call_operand.vmem [shape: f32[16,128], index: 5, kind: input, shape index: {}]   ;;  %s3540_s6 = inlined_call_operand.hbm [shape: f32[16,128], index: 6, kind: output, shape index: {0}]   ;;  %s3541_s7 = inlined_call_operand.hbm [shape: f32[1,1], index: 7, kind: output, shape index: {1}]  }
   0x1   :  { %14 = vsyncpa [#allocation7], 0 }
   0x2   :  { %15 = vsyncpa [#allocation10], 0 }
   0x3   :  { %16 = vsyncpa [#allocation4], 0 }
   0x4   :  { %17 = vsyncpa [#allocation5], 0  ;;  %s3339_s24 = smov [#allocation6]   ;;  %s3209_s28 = scalar_lea.hbm %s3535_s1, 28672 }
   0x5   :  { %s35_s25 = sshll.u32 %s3339_s24, 4  ;;  %p3210_p0 = scmp.ne.s32.totalorder %s3535_s1, %s3209_s28  ;;  %s36_s25 = int_to_ptr.vmem [resolvable:$true] %s35_s25 }
   0x6   :  { %p3213_p1 = scmp.lt.u32.totalorder %s3209_s28, %s3535_s1 }
   0x8   :  { %p3215_p2 = pnand %p3213_p1, %p3210_p0 }
   0xa   :  { %3218 = shalt.err (!%p3215_p2)
}
   0xb   :  { %s3219_s10 = scalar_lea.vmem %s36_s25, 28672  ;;  %p3224_p4 = scmp.lt.s32.totalorder %s36_s25, %s36_s25 }
   0xc   :  { %p3220_p3 = scmp.ne.s32.totalorder %s36_s25, %s3219_s10  ;;  %p3225_p5 = scmp.lt.s32.totalorder %s3219_s10, %s3219_s10 }
   0xe   :  { %p3226_p6 = por %p3225_p5, %p3224_p4 }
  0x10   :  { %p3227_p7 = pnand %p3226_p6, %p3220_p3 }
  0x12   :  { %3230 = shalt.err (!%p3227_p7)
}
  0x13   :  { %s3340_s11 = smov 256   ;;  %s3341_s12 = smov 16  }
  0x14   :  { %41 = dma.hbm_to_vmem [thread:$0]  %s3535_s1, 28672, %s36_s25, [#allocation7], %s3340_s11, %s3340_s11, %s3341_s12  }
  0x15   :  { %s3342_s15 = smov [#allocation2]   ;;  %s3231_s19 = scalar_lea.hbm %s3534_s0, 896 }
  0x16   :  { %s23_s16 = sshll.u32 %s3342_s15, 4  ;;  %p3232_p8 = scmp.ne.s32.totalorder %s3534_s0, %s3231_s19  ;;  %s24_s16 = int_to_ptr.vmem [resolvable:$true] %s23_s16 }
  0x17   :  { %p3235_p9 = scmp.lt.u32.totalorder %s3231_s19, %s3534_s0 }
  0x19   :  { %p3237_p10 = pnand %p3235_p9, %p3232_p8 }
  0x1b   :  { %3240 = shalt.err (!%p3237_p10)
}
  0x1c   :  { %s3241_s24 = scalar_lea.vmem %s24_s16, 896  ;;  %p3246_p12 = scmp.lt.s32.totalorder %s24_s16, %s24_s16 }
  0x1d   :  { %p3242_p11 = scmp.ne.s32.totalorder %s24_s16, %s3241_s24  ;;  %p3247_p13 = scmp.lt.s32.totalorder %s3241_s24, %s3241_s24 }
  0x1f   :  { %p3248_p0 = por %p3247_p13, %p3246_p12 }
  0x21   :  { %p3249_p1 = pnand %p3248_p0, %p3242_p11 }
  0x23   :  { %3252 = shalt.err (!%p3249_p1)
}
  0x24   :  { %s3343_s1 = smov 448   ;;  %s3344_s25 = smov 28  }
  0x25   :  { %29 = dma.hbm_to_vmem [thread:$0]  %s3534_s0, 896, %s24_s16, [#allocation3], %s3343_s1, %s3343_s1, %s3344_s25  }
  0x26   :  { %s3345_s28 = smov [#allocation8]   ;;  %s3346_s30 = smov [#allocation9]  }
  0x27   :  { %s48_s29 = sshll.u32 %s3345_s28, 4  ;;  %s57_s8 = sshll.u32 %s3346_s30, 4  ;;  %s49_s29 = int_to_ptr.vmem [resolvable:$true] %s48_s29  ;;  %s3416_s8 = int_to_ptr.vmem [resolvable:$true] %s57_s8 }
  0x28   :  { %s3253_s11 = scalar_lea.hbm %s3536_s2, 64 }
  0x29   :  { %p3254_p2 = scmp.ne.s32.totalorder %s3536_s2, %s3253_s11  ;;  %p3257_p3 = scmp.lt.u32.totalorder %s3253_s11, %s3536_s2 }
  0x2b   :  { %p3259_p4 = pnand %p3257_p3, %p3254_p2 }
  0x2d   :  { %3262 = shalt.err (!%p3259_p4)
}
  0x2e   :  { %s3263_s0 = scalar_lea.vmem %s49_s29, 64  ;;  %p3268_p6 = scmp.lt.s32.totalorder %s49_s29, %s49_s29 }
  0x2f   :  { %p3264_p5 = scmp.ne.s32.totalorder %s49_s29, %s3263_s0  ;;  %p3269_p7 = scmp.lt.s32.totalorder %s3263_s0, %s3263_s0 }
  0x31   :  { %p3270_p8 = por %p3269_p7, %p3268_p6 }
  0x33   :  { %p3271_p9 = pnand %p3270_p8, %p3264_p5 }
  0x35   :  { %3274 = shalt.err (!%p3271_p9)
}
  0x36   :  { %51 = dma.hbm_to_vmem [thread:$0]  %s3536_s2, 64, %s49_s29, [#allocation7]  }
  0x37   :  { %s3275_s20 = scalar_lea.hbm %s3537_s3, 8192 }
  0x38   :  { %p3276_p10 = scmp.ne.s32.totalorder %s3537_s3, %s3275_s20  ;;  %p3279_p11 = scmp.lt.u32.totalorder %s3275_s20, %s3537_s3 }
  0x3a   :  { %p3281_p12 = pnand %p3279_p11, %p3276_p10 }
  0x3c   :  { %3284 = shalt.err (!%p3281_p12)
}
  0x3d   :  { %s3285_s1 = scalar_lea.vmem %s3416_s8, 8192  ;;  %p3290_p0 = scmp.lt.s32.totalorder %s3416_s8, %s3416_s8 }
  0x3e   :  { %p3286_p13 = scmp.ne.s32.totalorder %s3416_s8, %s3285_s1  ;;  %p3291_p1 = scmp.lt.s32.totalorder %s3285_s1, %s3285_s1 }
  0x40   :  { %p3292_p2 = por %p3291_p1, %p3290_p0 }
  0x42   :  { %p3293_p3 = pnand %p3292_p2, %p3286_p13 }
  0x44   :  { %3296 = shalt.err (!%p3293_p3)
}
  0x45   :  { %s3347_s2 = smov 128   ;;  %s3348_s25 = smov 8  }
  0x46   :  { %63 = dma.hbm_to_vmem [thread:$0]  %s3537_s3, 8192, %s3416_s8, [#allocation10], %s3347_s2, %s3347_s2, %s3348_s25  }
  0x47   :  { %3329 = dma.done.wait [#allocation3], 896  }
  0x48   :  { %3330 = vsyncadd [#allocation3], 4294966400 }
  0x49   :  { %3331 = dma.done.wait [#allocation7], 28736  }
  0x4a   :  { %3332 = vsyncadd [#allocation7], 4294938560 }
  0x4b   :  { %3333 = dma.done.wait [#allocation10], 8192  }
  0x4c   :  { %3334 = vsyncadd [#allocation10], 4294959104  ;;  %v2763_v0 = vld [vmem:[#allocation6 + $0x4] ss:$16 sps:$4 sm:$0xff]   ;;  %v2767_v2 = vld [vmem:[#allocation6] ss:$16 sps:$4 sm:$0xff]  }
  0x4d   :  { %v2765_v1 = vld [vmem:[#allocation6 + $0x204] ss:$16 sps:$4 sm:$0xff]   ;;  %1491 = vmatprep.subr.bf16.mxu1 %v2763_v0  ;;  %v2768_v3 = vld [vmem:[#allocation6 + $0x200] ss:$16 sps:$4 sm:$0xff]   ;;  %v2861_v49 = vld [vmem:[#allocation2 + $0x4] ss:$28 sps:$4 sm:$0xff]  }
  0x4e   :  { %1534 = vmatprep.subr.bf16.mxu0 %v2765_v1  ;;  %v2769_v4 = vld [vmem:[#allocation6 + $0x24] ss:$16 sps:$4 sm:$0xff]   ;;  %1492 = vmatpush1.bf16.msra.mxu1 %v2767_v2  ;;  %v2773_v6 = vld [vmem:[#allocation6 + $0x20] ss:$16 sps:$4 sm:$0xff]   ;;  %s3350_s9 = smov [#allocation11]  }
  0x4f   :  { %1535 = vmatpush1.bf16.msra.mxu0 %v2768_v3  ;;  %v2771_v5 = vld [vmem:[#allocation6 + $0x224] ss:$16 sps:$4 sm:$0xff]   ;;  %1493 = vmatprep.subr.bf16.mxu1 %v2769_v4  ;;  %v2774_v7 = vld [vmem:[#allocation6 + $0x220] ss:$16 sps:$4 sm:$0xff]   ;;  %v2870_v3 = vld [vmem:[#allocation6 + $0xc] ss:$16 sps:$4 sm:$0xff]  }
  0x50   :  { %1536 = vmatprep.subr.bf16.mxu0 %v2771_v5  ;;  %v2775_v8 = vld [vmem:[#allocation6 + $0x44] ss:$16 sps:$4 sm:$0xff]   ;;  %v2779_v10 = vld [vmem:[#allocation6 + $0x40] ss:$16 sps:$4 sm:$0xff]   ;;  %1523 = vmatprep.mubr.bf16.mxu1 %v2861_v49 }
  0x51   :  { %v2777_v9 = vld [vmem:[#allocation6 + $0x244] ss:$16 sps:$4 sm:$0xff]   ;;  %v2780_v11 = vld [vmem:[#allocation6 + $0x240] ss:$16 sps:$4 sm:$0xff]  }
  0x52   :  { %1494 = vmatpush1.bf16.msra.mxu1 %v2773_v6  ;;  %v2781_v12 = vld [vmem:[#allocation6 + $0x64] ss:$16 sps:$4 sm:$0xff]   ;;  %v2785_v14 = vld [vmem:[#allocation6 + $0x60] ss:$16 sps:$4 sm:$0xff]  }
  0x53   :  { %1537 = vmatpush1.bf16.msra.mxu0 %v2774_v7  ;;  %1495 = vmatprep.subr.bf16.mxu1 %v2775_v8  ;;  %v2783_v13 = vld [vmem:[#allocation6 + $0x264] ss:$16 sps:$4 sm:$0xff]   ;;  %v2786_v15 = vld [vmem:[#allocation6 + $0x260] ss:$16 sps:$4 sm:$0xff]   ;;  %v2868_v7 = vld [vmem:[#allocation6 + $0x8] ss:$16 sps:$4 sm:$0xff]  }
  0x54   :  { %1538 = vmatprep.subr.bf16.mxu0 %v2777_v9  ;;  %v2787_v16 = vld [vmem:[#allocation6 + $0x84] ss:$16 sps:$4 sm:$0xff]   ;;  %v2791_v18 = vld [vmem:[#allocation6 + $0x80] ss:$16 sps:$4 sm:$0xff]   ;;  %v2876_v9 = vld [vmem:[#allocation6 + $0x2c] ss:$16 sps:$4 sm:$0xff]  }
  0x55   :  { %v2789_v17 = vld [vmem:[#allocation6 + $0x284] ss:$16 sps:$4 sm:$0xff]   ;;  %v2792_v19 = vld [vmem:[#allocation6 + $0x280] ss:$16 sps:$4 sm:$0xff]  }
  0x56   :  { %1496 = vmatpush1.bf16.msra.mxu1 %v2779_v10  ;;  %v2793_v20 = vld [vmem:[#allocation6 + $0xa4] ss:$16 sps:$4 sm:$0xff]   ;;  %v2797_v22 = vld [vmem:[#allocation6 + $0xa0] ss:$16 sps:$4 sm:$0xff]  }
  0x57   :  { %1539 = vmatpush1.bf16.msra.mxu0 %v2780_v11  ;;  %1497 = vmatprep.subr.bf16.mxu1 %v2781_v12  ;;  %v2795_v21 = vld [vmem:[#allocation6 + $0x2a4] ss:$16 sps:$4 sm:$0xff]   ;;  %v2798_v23 = vld [vmem:[#allocation6 + $0x2a0] ss:$16 sps:$4 sm:$0xff]   ;;  %v2874_v11 = vld [vmem:[#allocation6 + $0x28] ss:$16 sps:$4 sm:$0xff]  }
  0x58   :  { %1540 = vmatprep.subr.bf16.mxu0 %v2783_v13  ;;  %v2799_v24 = vld [vmem:[#allocation6 + $0xc4] ss:$16 sps:$4 sm:$0xff]   ;;  %v2803_v26 = vld [vmem:[#allocation6 + $0xc0] ss:$16 sps:$4 sm:$0xff]   ;;  %v2882_v13 = vld [vmem:[#allocation6 + $0x4c] ss:$16 sps:$4 sm:$0xff]  }
  0x59   :  { %v2801_v25 = vld [vmem:[#allocation6 + $0x2c4] ss:$16 sps:$4 sm:$0xff]   ;;  %v2804_v27 = vld [vmem:[#allocation6 + $0x2c0] ss:$16 sps:$4 sm:$0xff]  }
  0x5a   :  { %1498 = vmatpush1.bf16.msra.mxu1 %v2785_v14  ;;  %v2805_v28 = vld [vmem:[#allocation6 + $0xe4] ss:$16 sps:$4 sm:$0xff]   ;;  %v2809_v30 = vld [vmem:[#allocation6 + $0xe0] ss:$16 sps:$4 sm:$0xff]  }
  0x5b   :  { %1541 = vmatpush1.bf16.msra.mxu0 %v2786_v15  ;;  %1499 = vmatprep.subr.bf16.mxu1 %v2787_v16  ;;  %v2807_v29 = vld [vmem:[#allocation6 + $0x2e4] ss:$16 sps:$4 sm:$0xff]   ;;  %v2810_v31 = vld [vmem:[#allocation6 + $0x2e0] ss:$16 sps:$4 sm:$0xff]   ;;  %v2880_v15 = vld [vmem:[#allocation6 + $0x48] ss:$16 sps:$4 sm:$0xff]  }
  0x5c   :  { %1542 = vmatprep.subr.bf16.mxu0 %v2789_v17  ;;  %v2811_v32 = vld [vmem:[#allocation6 + $0x104] ss:$16 sps:$4 sm:$0xff]   ;;  %v2815_v34 = vld [vmem:[#allocation6 + $0x100] ss:$16 sps:$4 sm:$0xff]   ;;  %v2888_v17 = vld [vmem:[#allocation6 + $0x6c] ss:$16 sps:$4 sm:$0xff]  }
  0x5d   :  { %v2813_v33 = vld [vmem:[#allocation6 + $0x304] ss:$16 sps:$4 sm:$0xff]   ;;  %v2816_v35 = vld [vmem:[#allocation6 + $0x300] ss:$16 sps:$4 sm:$0xff]  }
  0x5e   :  { %1500 = vmatpush1.bf16.msra.mxu1 %v2791_v18  ;;  %v2817_v36 = vld [vmem:[#allocation6 + $0x124] ss:$16 sps:$4 sm:$0xff]   ;;  %v2821_v38 = vld [vmem:[#allocation6 + $0x120] ss:$16 sps:$4 sm:$0xff]  }
  0x5f   :  { %1543 = vmatpush1.bf16.msra.mxu0 %v2792_v19  ;;  %1501 = vmatprep.subr.bf16.mxu1 %v2793_v20  ;;  %v2819_v37 = vld [vmem:[#allocation6 + $0x324] ss:$16 sps:$4 sm:$0xff]   ;;  %v2822_v39 = vld [vmem:[#allocation6 + $0x320] ss:$16 sps:$4 sm:$0xff]   ;;  %v2886_v19 = vld [vmem:[#allocation6 + $0x68] ss:$16 sps:$4 sm:$0xff]  }
  0x60   :  { %1544 = vmatprep.subr.bf16.mxu0 %v2795_v21  ;;  %v2823_v40 = vld [vmem:[#allocation6 + $0x144] ss:$16 sps:$4 sm:$0xff]   ;;  %v2827_v42 = vld [vmem:[#allocation6 + $0x140] ss:$16 sps:$4 sm:$0xff]   ;;  %v2894_v21 = vld [vmem:[#allocation6 + $0x8c] ss:$16 sps:$4 sm:$0xff]  }
  0x61   :  { %v2825_v41 = vld [vmem:[#allocation6 + $0x344] ss:$16 sps:$4 sm:$0xff]   ;;  %v2828_v43 = vld [vmem:[#allocation6 + $0x340] ss:$16 sps:$4 sm:$0xff]  }
  0x62   :  { %1502 = vmatpush1.bf16.msra.mxu1 %v2797_v22  ;;  %v2829_v44 = vld [vmem:[#allocation6 + $0x164] ss:$16 sps:$4 sm:$0xff]   ;;  %v2833_v46 = vld [vmem:[#allocation6 + $0x160] ss:$16 sps:$4 sm:$0xff]  }
  0x63   :  { %1545 = vmatpush1.bf16.msra.mxu0 %v2798_v23  ;;  %1503 = vmatprep.subr.bf16.mxu1 %v2799_v24  ;;  %v2831_v45 = vld [vmem:[#allocation6 + $0x364] ss:$16 sps:$4 sm:$0xff]   ;;  %v2834_v47 = vld [vmem:[#allocation6 + $0x360] ss:$16 sps:$4 sm:$0xff]   ;;  %v2892_v23 = vld [vmem:[#allocation6 + $0x88] ss:$16 sps:$4 sm:$0xff]  }
  0x64   :  { %1546 = vmatprep.subr.bf16.mxu0 %v2801_v25  ;;  %v2835_v48 = vld [vmem:[#allocation6 + $0x184] ss:$16 sps:$4 sm:$0xff]   ;;  %v2839_v52 = vld [vmem:[#allocation6 + $0x180] ss:$16 sps:$4 sm:$0xff]   ;;  %v2900_v25 = vld [vmem:[#allocation6 + $0xac] ss:$16 sps:$4 sm:$0xff]  }
  0x65   :  { %v2837_v50 = vld [vmem:[#allocation6 + $0x384] ss:$16 sps:$4 sm:$0xff]   ;;  %v2840_v53 = vld [vmem:[#allocation6 + $0x380] ss:$16 sps:$4 sm:$0xff]  }
  0x66   :  { %1504 = vmatpush1.bf16.msra.mxu1 %v2803_v26  ;;  %v3450_v51 = vld [vmem:[#allocation2 + $0xc] ss:$28 sps:$4 sm:$0xff]   ;;  %v3453_v4 = vld [vmem:[#allocation2] ss:$28 sps:$4 sm:$0xff]  }
  0x67   :  { %1547 = vmatpush1.bf16.msra.mxu0 %v2804_v27  ;;  %1505 = vmatprep.subr.bf16.mxu1 %v2805_v28  ;;  %v2841_v54 = vld [vmem:[#allocation6 + $0x1a4] ss:$16 sps:$4 sm:$0xff]   ;;  %v2845_v56 = vld [vmem:[#allocation6 + $0x1a0] ss:$16 sps:$4 sm:$0xff]   ;;  %v2898_v27 = vld [vmem:[#allocation6 + $0xa8] ss:$16 sps:$4 sm:$0xff]  }
  0x68   :  { %1548 = vmatprep.subr.bf16.mxu0 %v2807_v29  ;;  %1566 = vmatprep.mubr.bf16.mxu0 %v3450_v51  ;;  %v2843_v55 = vld [vmem:[#allocation6 + $0x3a4] ss:$16 sps:$4 sm:$0xff]   ;;  %v2846_v57 = vld [vmem:[#allocation6 + $0x3a0] ss:$16 sps:$4 sm:$0xff]   ;;  %v2906_v29 = vld [vmem:[#allocation6 + $0xcc] ss:$16 sps:$4 sm:$0xff]  }
  0x69   :  { %v2847_v58 = vld [vmem:[#allocation6 + $0x1c4] ss:$16 sps:$4 sm:$0xff]   ;;  %v2851_v60 = vld [vmem:[#allocation6 + $0x1c0] ss:$16 sps:$4 sm:$0xff]  }
  0x6a   :  { %1506 = vmatpush1.bf16.msra.mxu1 %v2809_v30  ;;  %v2849_v59 = vld [vmem:[#allocation6 + $0x3c4] ss:$16 sps:$4 sm:$0xff]   ;;  %v2852_v61 = vld [vmem:[#allocation6 + $0x3c0] ss:$16 sps:$4 sm:$0xff]  }
  0x6b   :  { %1549 = vmatpush1.bf16.msra.mxu0 %v2810_v31  ;;  %1507 = vmatprep.subr.bf16.mxu1 %v2811_v32  ;;  %v2853_v62 = vld [vmem:[#allocation6 + $0x1e4] ss:$16 sps:$4 sm:$0xff]   ;;  %v2857_v0 = vld [vmem:[#allocation6 + $0x1e0] ss:$16 sps:$4 sm:$0xff]   ;;  %v2904_v31 = vld [vmem:[#allocation6 + $0xc8] ss:$16 sps:$4 sm:$0xff]  }
  0x6c   :  { %1550 = vmatprep.subr.bf16.mxu0 %v2813_v33  ;;  %v2855_v63 = vld [vmem:[#allocation6 + $0x3e4] ss:$16 sps:$4 sm:$0xff]   ;;  %v2858_v1 = vld [vmem:[#allocation6 + $0x3e0] ss:$16 sps:$4 sm:$0xff]   ;;  %v2912_v33 = vld [vmem:[#allocation6 + $0xec] ss:$16 sps:$4 sm:$0xff]  }
  0x6d   :  { %v2867_v2 = vld [vmem:[#allocation6 + $0x404] ss:$16 sps:$4 sm:$0xff]   ;;  %v3455_v5 = vld [vmem:[#allocation2 + $0x8] ss:$28 sps:$4 sm:$0xff]  }
  0x6e   :  { %1508 = vmatpush1.bf16.msra.mxu1 %v2815_v34  ;;  %v2865_v6 = vld [vmem:[#allocation6 + $0x400] ss:$16 sps:$4 sm:$0xff]   ;;  %v2873_v8 = vld [vmem:[#allocation6 + $0x424] ss:$16 sps:$4 sm:$0xff]   ;;  %v3459_v34 = vld [vmem:[#allocation2 + $0x14] ss:$28 sps:$4 sm:$0xff]  }
  0x6f   :  { %1551 = vmatpush1.bf16.msra.mxu0 %v2816_v35  ;;  %1509 = vmatprep.subr.bf16.mxu1 %v2817_v36  ;;  %v2871_v10 = vld [vmem:[#allocation6 + $0x420] ss:$16 sps:$4 sm:$0xff]   ;;  %v2879_v12 = vld [vmem:[#allocation6 + $0x444] ss:$16 sps:$4 sm:$0xff]   ;;  %v2910_v36 = vld [vmem:[#allocation6 + $0xe8] ss:$16 sps:$4 sm:$0xff]  }
  0x70   :  { %1552 = vmatprep.subr.bf16.mxu0 %v2819_v37  ;;  %v2877_v14 = vld [vmem:[#allocation6 + $0x440] ss:$16 sps:$4 sm:$0xff]   ;;  %v2885_v16 = vld [vmem:[#allocation6 + $0x464] ss:$16 sps:$4 sm:$0xff]  }
  0x71   :  { %v2883_v18 = vld [vmem:[#allocation6 + $0x460] ss:$16 sps:$4 sm:$0xff]   ;;  %v2891_v20 = vld [vmem:[#allocation6 + $0x484] ss:$16 sps:$4 sm:$0xff]  }
  0x72   :  { %1510 = vmatpush1.bf16.msra.mxu1 %v2821_v38  ;;  %v2889_v22 = vld [vmem:[#allocation6 + $0x480] ss:$16 sps:$4 sm:$0xff]   ;;  %v2897_v24 = vld [vmem:[#allocation6 + $0x4a4] ss:$16 sps:$4 sm:$0xff]   ;;  %v2918_v38 = vld [vmem:[#allocation6 + $0x10c] ss:$16 sps:$4 sm:$0xff]  }
  0x73   :  { %1553 = vmatpush1.bf16.msra.mxu0 %v2822_v39  ;;  %1511 = vmatprep.subr.bf16.mxu1 %v2823_v40  ;;  %v2895_v26 = vld [vmem:[#allocation6 + $0x4a0] ss:$16 sps:$4 sm:$0xff]   ;;  %v2903_v28 = vld [vmem:[#allocation6 + $0x4c4] ss:$16 sps:$4 sm:$0xff]   ;;  %v2916_v40 = vld [vmem:[#allocation6 + $0x108] ss:$16 sps:$4 sm:$0xff]  }
  0x74   :  { %1554 = vmatprep.subr.bf16.mxu0 %v2825_v41  ;;  %v2901_v30 = vld [vmem:[#allocation6 + $0x4c0] ss:$16 sps:$4 sm:$0xff]   ;;  %v2909_v32 = vld [vmem:[#allocation6 + $0x4e4] ss:$16 sps:$4 sm:$0xff]  }
  0x75   :  { %v2907_v35 = vld [vmem:[#allocation6 + $0x4e0] ss:$16 sps:$4 sm:$0xff]   ;;  %v2915_v37 = vld [vmem:[#allocation6 + $0x504] ss:$16 sps:$4 sm:$0xff]  }
  0x76   :  { %1512 = vmatpush1.bf16.msra.mxu1 %v2827_v42  ;;  %v2913_v39 = vld [vmem:[#allocation6 + $0x500] ss:$16 sps:$4 sm:$0xff]   ;;  %v2921_v41 = vld [vmem:[#allocation6 + $0x524] ss:$16 sps:$4 sm:$0xff]   ;;  %v2924_v42 = vld [vmem:[#allocation6 + $0x12c] ss:$16 sps:$4 sm:$0xff]  }
  0x77   :  { %1555 = vmatpush1.bf16.msra.mxu0 %v2828_v43  ;;  %1513 = vmatprep.subr.bf16.mxu1 %v2829_v44  ;;  %v2919_v43 = vld [vmem:[#allocation6 + $0x520] ss:$16 sps:$4 sm:$0xff]   ;;  %v2922_v44 = vld [vmem:[#allocation6 + $0x128] ss:$16 sps:$4 sm:$0xff]  }
  0x78   :  { %1556 = vmatprep.subr.bf16.mxu0 %v2831_v45  ;;  %v2927_v45 = vld [vmem:[#allocation6 + $0x544] ss:$16 sps:$4 sm:$0xff]  }
  0x7a   :  { %1514 = vmatpush1.bf16.msra.mxu1 %v2833_v46  ;;  %v2930_v46 = vld [vmem:[#allocation6 + $0x14c] ss:$16 sps:$4 sm:$0xff]  }
  0x7b   :  { %1557 = vmatpush1.bf16.msra.mxu0 %v2834_v47  ;;  %1515 = vmatprep.subr.bf16.mxu1 %v2835_v48  ;;  %v2925_v47 = vld [vmem:[#allocation6 + $0x540] ss:$16 sps:$4 sm:$0xff]   ;;  %v2928_v48 = vld [vmem:[#allocation6 + $0x148] ss:$16 sps:$4 sm:$0xff]  }
  0x7c   :  { %1558 = vmatprep.subr.bf16.mxu0 %v2837_v50  ;;  %v2936_v50 = vld [vmem:[#allocation6 + $0x16c] ss:$16 sps:$4 sm:$0xff]  }
  0x7e   :  { %1516 = vmatpush1.bf16.msra.mxu1 %v2839_v52  ;;  %v2931_v52 = vld [vmem:[#allocation6 + $0x560] ss:$16 sps:$4 sm:$0xff]  }
  0x7f   :  { %1559 = vmatpush1.bf16.msra.mxu0 %v2840_v53  ;;  %1517 = vmatprep.subr.bf16.mxu1 %v2841_v54  ;;  %v2934_v53 = vld [vmem:[#allocation6 + $0x168] ss:$16 sps:$4 sm:$0xff]   ;;  %v2939_v54 = vld [vmem:[#allocation6 + $0x584] ss:$16 sps:$4 sm:$0xff]  }
  0x80   :  { %1560 = vmatprep.subr.bf16.mxu0 %v2843_v55  ;;  %v2942_v55 = vld [vmem:[#allocation6 + $0x18c] ss:$16 sps:$4 sm:$0xff]  }
  0x82   :  { %1518 = vmatpush1.bf16.msra.mxu1 %v2845_v56  ;;  %v2937_v56 = vld [vmem:[#allocation6 + $0x580] ss:$16 sps:$4 sm:$0xff]  }
  0x83   :  { %1561 = vmatpush1.bf16.msra.mxu0 %v2846_v57  ;;  %1519 = vmatprep.subr.bf16.mxu1 %v2847_v58  ;;  %v2940_v57 = vld [vmem:[#allocation6 + $0x188] ss:$16 sps:$4 sm:$0xff]   ;;  %v2945_v58 = vld [vmem:[#allocation6 + $0x5a4] ss:$16 sps:$4 sm:$0xff]  }
  0x84   :  { %1562 = vmatprep.subr.bf16.mxu0 %v2849_v59  ;;  %v2948_v59 = vld [vmem:[#allocation6 + $0x1ac] ss:$16 sps:$4 sm:$0xff]  }
  0x86   :  { %1520 = vmatpush1.bf16.msra.mxu1 %v2851_v60  ;;  %v2943_v60 = vld [vmem:[#allocation6 + $0x5a0] ss:$16 sps:$4 sm:$0xff]  }
  0x87   :  { %1563 = vmatpush1.bf16.msra.mxu0 %v2852_v61  ;;  %1521 = vmatprep.subr.bf16.mxu1 %v2853_v62  ;;  %v2946_v61 = vld [vmem:[#allocation6 + $0x1a8] ss:$16 sps:$4 sm:$0xff]   ;;  %v2951_v62 = vld [vmem:[#allocation6 + $0x5c4] ss:$16 sps:$4 sm:$0xff]  }
  0x88   :  { %1564 = vmatprep.subr.bf16.mxu0 %v2855_v63  ;;  %v2954_v63 = vld [vmem:[#allocation6 + $0x1cc] ss:$16 sps:$4 sm:$0xff]  }
  0x8a   :  { %1522 = vmatpush1.bf16.msra.mxu1 %v2857_v0  ;;  %v2949_v0 = vld [vmem:[#allocation6 + $0x5c0] ss:$16 sps:$4 sm:$0xff]  }
  0x8b   :  { %1565 = vmatpush1.bf16.msra.mxu0 %v2858_v1  ;;  %1663 = vmatprep.subr.bf16.mxu1 %v2870_v3  ;;  %v2952_v1 = vld [vmem:[#allocation6 + $0x1c8] ss:$16 sps:$4 sm:$0xff]   ;;  %v2960_v3 = vld [vmem:[#allocation6 + $0x1ec] ss:$16 sps:$4 sm:$0xff]  }
  0x8c   :  { %1577 = vmatprep.subr.bf16.mxu0 %v2867_v2  ;;  %v2957_v2 = vld [vmem:[#allocation6 + $0x5e4] ss:$16 sps:$4 sm:$0xff]  }
  0x8d   :  { %1524 = vmatmul.mubr.bf16.vlgmr.msra.gmra.mrb[0].mxu1 %v3453_v4 }
  0x8e   :  { %1567 = vmatmul.mubr.bf16.vlgmr.msra.gmra.mrb[0].mxu0 %v3455_v5  ;;  %1664 = vmatpush1.bf16.msra.mxu1 %v2868_v7  ;;  %v2958_v7 = vld [vmem:[#allocation6 + $0x1e8] ss:$16 sps:$4 sm:$0xff]  }
  0x8f   :  { %1578 = vmatpush1.bf16.msra.mxu0 %v2865_v6  ;;  %1665 = vmatprep.subr.bf16.mxu1 %v2876_v9  ;;  %v2955_v6 = vld [vmem:[#allocation6 + $0x5e0] ss:$16 sps:$4 sm:$0xff]   ;;  %v2969_v9 = vld [vmem:[#allocation6 + $0x20c] ss:$16 sps:$4 sm:$0xff]  }
  0x90   :  { %1579 = vmatprep.subr.bf16.mxu0 %v2873_v8  ;;  %1695 = vmatprep.mubr.bf16.mxu1 %v2861_v49  ;;  %v2933_v49 = vld [vmem:[#allocation6 + $0x564] ss:$16 sps:$4 sm:$0xff]  }
  0x91   :  { %1609 = vmatprep.mubr.bf16.mxu0 %v3459_v34  ;;  %v2966_v8 = vld [vmem:[#allocation6 + $0x604] ss:$16 sps:$4 sm:$0xff]  }
  0x92   :  { %1666 = vmatpush1.bf16.msra.mxu1 %v2874_v11  ;;  %v2964_v11 = vld [vmem:[#allocation6 + $0x600] ss:$16 sps:$4 sm:$0xff]  }
  0x93   :  { %1580 = vmatpush1.bf16.msra.mxu0 %v2871_v10  ;;  %1667 = vmatprep.subr.bf16.mxu1 %v2882_v13  ;;  %v3462_v10 = vld [vmem:[#allocation2 + $0x10] ss:$28 sps:$4 sm:$0xff]  }
  0x94   :  { %1581 = vmatprep.subr.bf16.mxu0 %v2879_v12  ;;  %v2967_v12 = vld [vmem:[#allocation6 + $0x208] ss:$16 sps:$4 sm:$0xff]   ;;  %v2972_v13 = vld [vmem:[#allocation6 + $0x624] ss:$16 sps:$4 sm:$0xff]  }
  0x96   :  { %1668 = vmatpush1.bf16.msra.mxu1 %v2880_v15  ;;  %v2970_v15 = vld [vmem:[#allocation6 + $0x620] ss:$16 sps:$4 sm:$0xff]  }
  0x97   :  { %1582 = vmatpush1.bf16.msra.mxu0 %v2877_v14  ;;  %1669 = vmatprep.subr.bf16.mxu1 %v2888_v17  ;;  %v2975_v14 = vld [vmem:[#allocation6 + $0x22c] ss:$16 sps:$4 sm:$0xff]   ;;  %v2978_v17 = vld [vmem:[#allocation6 + $0x644] ss:$16 sps:$4 sm:$0xff]  }
  0x98   :  { %1583 = vmatprep.subr.bf16.mxu0 %v2885_v16  ;;  %v2973_v16 = vld [vmem:[#allocation6 + $0x228] ss:$16 sps:$4 sm:$0xff]  }
  0x9a   :  { %1670 = vmatpush1.bf16.msra.mxu1 %v2886_v19  ;;  %v3349_v19 = vmov 0  }
  0x9b   :  { %1584 = vmatpush1.bf16.msra.mxu0 %v2883_v18  ;;  %1671 = vmatprep.subr.bf16.mxu1 %v2894_v21  ;;  %v2981_v18 = vld [vmem:[#allocation6 + $0x24c] ss:$16 sps:$4 sm:$0xff]   ;;  %v2979_v21 = vld [vmem:[#allocation6 + $0x248] ss:$16 sps:$4 sm:$0xff]  }
  0x9c   :  { %1585 = vmatprep.subr.bf16.mxu0 %v2891_v20  ;;  %v2976_v20 = vld [vmem:[#allocation6 + $0x640] ss:$16 sps:$4 sm:$0xff]  }
  0x9e   :  { %1672 = vmatpush1.bf16.msra.mxu1 %v2892_v23  ;;  %v2982_v23 = vld [vmem:[#allocation6 + $0x660] ss:$16 sps:$4 sm:$0xff]  }
  0x9f   :  { %1586 = vmatpush1.bf16.msra.mxu0 %v2889_v22  ;;  %1673 = vmatprep.subr.bf16.mxu1 %v2900_v25  ;;  %v2984_v22 = vld [vmem:[#allocation6 + $0x664] ss:$16 sps:$4 sm:$0xff]  }
  0xa0   :  { %1587 = vmatprep.subr.bf16.mxu0 %v2897_v24  ;;  %v2985_v24 = vld [vmem:[#allocation6 + $0x268] ss:$16 sps:$4 sm:$0xff]   ;;  %v2990_v25 = vld [vmem:[#allocation6 + $0x684] ss:$16 sps:$4 sm:$0xff]  }
  0xa2   :  { %1674 = vmatpush1.bf16.msra.mxu1 %v2898_v27  ;;  %v2988_v27 = vld [vmem:[#allocation6 + $0x680] ss:$16 sps:$4 sm:$0xff]  }
  0xa3   :  { %1588 = vmatpush1.bf16.msra.mxu0 %v2895_v26  ;;  %1675 = vmatprep.subr.bf16.mxu1 %v2906_v29  ;;  %v2993_v26 = vld [vmem:[#allocation6 + $0x28c] ss:$16 sps:$4 sm:$0xff]  }
  0xa4   :  { %1589 = vmatprep.subr.bf16.mxu0 %v2903_v28  ;;  %v2996_v28 = vld [vmem:[#allocation6 + $0x6a4] ss:$16 sps:$4 sm:$0xff]   ;;  %v2999_v29 = vld [vmem:[#allocation6 + $0x2ac] ss:$16 sps:$4 sm:$0xff]  }
  0xa6   :  { %1676 = vmatpush1.bf16.msra.mxu1 %v2904_v31  ;;  %v2997_v31 = vld [vmem:[#allocation6 + $0x2a8] ss:$16 sps:$4 sm:$0xff]  }
  0xa7   :  { %1590 = vmatpush1.bf16.msra.mxu0 %v2901_v30  ;;  %1677 = vmatprep.subr.bf16.mxu1 %v2912_v33  ;;  %v2994_v30 = vld [vmem:[#allocation6 + $0x6a0] ss:$16 sps:$4 sm:$0xff]   ;;  %v3005_v33 = vld [vmem:[#allocation6 + $0x2cc] ss:$16 sps:$4 sm:$0xff]  }
  0xa8   :  { %1591 = vmatprep.subr.bf16.mxu0 %v2909_v32  ;;  %v3002_v32 = vld [vmem:[#allocation6 + $0x6c4] ss:$16 sps:$4 sm:$0xff]  }
  0xaa   :  { %1678 = vmatpush1.bf16.msra.mxu1 %v2910_v36  ;;  %v3003_v36 = vld [vmem:[#allocation6 + $0x2c8] ss:$16 sps:$4 sm:$0xff]  }
  0xab   :  { %1592 = vmatpush1.bf16.msra.mxu0 %v2907_v35  ;;  %1679 = vmatprep.subr.bf16.mxu1 %v2918_v38  ;;  %v3000_v35 = vld [vmem:[#allocation6 + $0x6c0] ss:$16 sps:$4 sm:$0xff]   ;;  %v3011_v38 = vld [vmem:[#allocation6 + $0x2ec] ss:$16 sps:$4 sm:$0xff]  }
  0xac   :  { %1593 = vmatprep.subr.bf16.mxu0 %v2915_v37  ;;  %v3008_v37 = vld [vmem:[#allocation6 + $0x6e4] ss:$16 sps:$4 sm:$0xff]  }
  0xae   :  { %1680 = vmatpush1.bf16.msra.mxu1 %v2916_v40  ;;  %v3009_v40 = vld [vmem:[#allocation6 + $0x2e8] ss:$16 sps:$4 sm:$0xff]  }
  0xaf   :  { %1594 = vmatpush1.bf16.msra.mxu0 %v2913_v39  ;;  %1681 = vmatprep.subr.bf16.mxu1 %v2924_v42  ;;  %v3006_v39 = vld [vmem:[#allocation6 + $0x6e0] ss:$16 sps:$4 sm:$0xff]  }
  0xb0   :  { %1595 = vmatprep.subr.bf16.mxu0 %v2921_v41  ;;  %v3015_v41 = vld [vmem:[#allocation6 + $0x30c] ss:$16 sps:$4 sm:$0xff]  }
  0xb1   :  { %v3468_v42 = vld [vmem:[#allocation2 + $0x18] ss:$28 sps:$4 sm:$0xff]  }
  0xb2   :  { %1682 = vmatpush1.bf16.msra.mxu1 %v2922_v44  ;;  %v3018_v44 = vld [vmem:[#allocation6 + $0x32c] ss:$16 sps:$4 sm:$0xff]  }
  0xb3   :  { %1596 = vmatpush1.bf16.msra.mxu0 %v2919_v43  ;;  %1683 = vmatprep.subr.bf16.mxu1 %v2930_v46  ;;  %v3013_v43 = vld [vmem:[#allocation6 + $0x308] ss:$16 sps:$4 sm:$0xff]  }
  0xb4   :  { %1597 = vmatprep.subr.bf16.mxu0 %v2927_v45  ;;  %v3109_v45 = vld [vmem:[#allocation9] ss:$8 sps:$4 sm:$0xff]   ;;  %v3111_v46 = vld [vmem:[#allocation9 + $0x4] ss:$8 sps:$4 sm:$0xff]  }
  0xb6   :  { %1684 = vmatpush1.bf16.msra.mxu1 %v2928_v48  ;;  %v3114_v48 = vld [vmem:[#allocation9 + $0x14] ss:$8 sps:$4 sm:$0xff]  }
  0xb7   :  { %1598 = vmatpush1.bf16.msra.mxu0 %v2925_v47  ;;  %1685 = vmatprep.subr.bf16.mxu1 %v2936_v50  ;;  %v3016_v47 = vld [vmem:[#allocation6 + $0x328] ss:$16 sps:$4 sm:$0xff]   ;;  %v3112_v50 = vld [vmem:[#allocation9 + $0x10] ss:$8 sps:$4 sm:$0xff]  }
  0xb8   :  { %1599 = vmatprep.subr.bf16.mxu0 %v2933_v49  ;;  %v3021_v49 = vld [vmem:[#allocation6 + $0x34c] ss:$16 sps:$4 sm:$0xff]  }
  0xba   :  { %1686 = vmatpush1.bf16.msra.mxu1 %v2934_v53  ;;  %v3019_v53 = vld [vmem:[#allocation6 + $0x348] ss:$16 sps:$4 sm:$0xff]  }
  0xbb   :  { %1600 = vmatpush1.bf16.msra.mxu0 %v2931_v52  ;;  %1687 = vmatprep.subr.bf16.mxu1 %v2942_v55  ;;  %v3117_v52 = vld [vmem:[#allocation9 + $0x24] ss:$8 sps:$4 sm:$0xff]  }
  0xbc   :  { %1601 = vmatprep.subr.bf16.mxu0 %v2939_v54  ;;  %v3024_v54 = vld [vmem:[#allocation6 + $0x36c] ss:$16 sps:$4 sm:$0xff]   ;;  %v3022_v55 = vld [vmem:[#allocation6 + $0x368] ss:$16 sps:$4 sm:$0xff]  }
  0xbe   :  { %1688 = vmatpush1.bf16.msra.mxu1 %v2940_v57  ;;  %v3027_v57 = vld [vmem:[#allocation6 + $0x38c] ss:$16 sps:$4 sm:$0xff]  }
  0xbf   :  { %1602 = vmatpush1.bf16.msra.mxu0 %v2937_v56  ;;  %1689 = vmatprep.subr.bf16.mxu1 %v2948_v59  ;;  %v3115_v56 = vld [vmem:[#allocation9 + $0x20] ss:$8 sps:$4 sm:$0xff]   ;;  %v3118_v59 = vld [vmem:[#allocation9 + $0x30] ss:$8 sps:$4 sm:$0xff]  }
  0xc0   :  { %1603 = vmatprep.subr.bf16.mxu0 %v2945_v58  ;;  %v3120_v58 = vld [vmem:[#allocation9 + $0x34] ss:$8 sps:$4 sm:$0xff]  }
  0xc2   :  { %1690 = vmatpush1.bf16.msra.mxu1 %v2946_v61  ;;  %v3025_v61 = vld [vmem:[#allocation6 + $0x388] ss:$16 sps:$4 sm:$0xff]  }
  0xc3   :  { %1604 = vmatpush1.bf16.msra.mxu0 %v2943_v60  ;;  %1691 = vmatprep.subr.bf16.mxu1 %v2954_v63  ;;  %v3123_v60 = vld [vmem:[#allocation9 + $0x44] ss:$8 sps:$4 sm:$0xff]   ;;  %v3121_v63 = vld [vmem:[#allocation9 + $0x40] ss:$8 sps:$4 sm:$0xff]  }
  0xc4   :  { %1605 = vmatprep.subr.bf16.mxu0 %v2951_v62  ;;  %v3030_v62 = vld [vmem:[#allocation6 + $0x3ac] ss:$16 sps:$4 sm:$0xff]  }
  0xc6   :  { %1692 = vmatpush1.bf16.msra.mxu1 %v2952_v1  ;;  %v3028_v1 = vld [vmem:[#allocation6 + $0x3a8] ss:$16 sps:$4 sm:$0xff]  }
  0xc7   :  { %1606 = vmatpush1.bf16.msra.mxu0 %v2949_v0  ;;  %1693 = vmatprep.subr.bf16.mxu1 %v2960_v3  ;;  %v3126_v0 = vld [vmem:[#allocation9 + $0x54] ss:$8 sps:$4 sm:$0xff]   ;;  %v3124_v3 = vld [vmem:[#allocation9 + $0x50] ss:$8 sps:$4 sm:$0xff]  }
  0xc8   :  { %1607 = vmatprep.subr.bf16.mxu0 %v2957_v2  ;;  %v3033_v2 = vld [vmem:[#allocation6 + $0x3cc] ss:$16 sps:$4 sm:$0xff]  }
  0xca   :  { %1694 = vmatpush1.bf16.msra.mxu1 %v2958_v7  ;;  %v3031_v7 = vld [vmem:[#allocation6 + $0x3c8] ss:$16 sps:$4 sm:$0xff]  }
  0xcb   :  { %1608 = vmatpush1.bf16.msra.mxu0 %v2955_v6  ;;  %1706 = vmatprep.subr.bf16.mxu1 %v2969_v9  ;;  %v3129_v6 = vld [vmem:[#allocation9 + $0x64] ss:$8 sps:$4 sm:$0xff]   ;;  %v3127_v9 = vld [vmem:[#allocation9 + $0x60] ss:$8 sps:$4 sm:$0xff]  }
  0xcc   :  { %1620 = vmatprep.subr.bf16.mxu0 %v2966_v8  ;;  %v3036_v8 = vld [vmem:[#allocation6 + $0x3ec] ss:$16 sps:$4 sm:$0xff]  }
  0xcd   :  { %1696 = vmatmul.mubr.bf16.vlgmr.msra.gmra.mrb[4].mxu1 %v3453_v4  ;;  %v2987_v4 = vld [vmem:[#allocation6 + $0x26c] ss:$16 sps:$4 sm:$0xff]  }
  0xce   :  { %1610 = vmatmul.mubr.bf16.vlgmr.msra.gmra.mrb[0].mxu0 %v3462_v10  ;;  %1707 = vmatpush1.bf16.msra.mxu1 %v2967_v12  ;;  %v3034_v12 = vld [vmem:[#allocation6 + $0x3e8] ss:$16 sps:$4 sm:$0xff]  }
  0xcf   :  { %1621 = vmatpush1.bf16.msra.mxu0 %v2964_v11  ;;  %1708 = vmatprep.subr.bf16.mxu1 %v2975_v14  ;;  %v3132_v11 = vld [vmem:[#allocation9 + $0x74] ss:$8 sps:$4 sm:$0xff]   ;;  %v3130_v14 = vld [vmem:[#allocation9 + $0x70] ss:$8 sps:$4 sm:$0xff]  }
  0xd0   :  { %1622 = vmatprep.subr.bf16.mxu0 %v2972_v13  ;;  %1652 = vmatprep.mubr.bf16.mxu0 %v3349_v19  ;;  %v3039_v13 = vld [vmem:[#allocation6 + $0x40c] ss:$16 sps:$4 sm:$0xff]  }
  0xd1   :  { %1738 = vmatprep.mubr.bf16.mxu1 %v3450_v51  ;;  %v2991_v51 = vld [vmem:[#allocation6 + $0x288] ss:$16 sps:$4 sm:$0xff]  }
  0xd2   :  { %1709 = vmatpush1.bf16.msra.mxu1 %v2973_v16  ;;  %v3037_v16 = vld [vmem:[#allocation6 + $0x408] ss:$16 sps:$4 sm:$0xff]  }
  0xd3   :  { %1623 = vmatpush1.bf16.msra.mxu0 %v2970_v15  ;;  %1710 = vmatprep.subr.bf16.mxu1 %v2981_v18  ;;  %v3135_v15 = vld [vmem:[#allocation9 + $0x84] ss:$8 sps:$4 sm:$0xff]   ;;  %v3133_v18 = vld [vmem:[#allocation9 + $0x80] ss:$8 sps:$4 sm:$0xff]  }
  0xd4   :  { %1624 = vmatprep.subr.bf16.mxu0 %v2978_v17  ;;  %v3042_v17 = vld [vmem:[#allocation6 + $0x42c] ss:$16 sps:$4 sm:$0xff]  }
  0xd6   :  { %1711 = vmatpush1.bf16.msra.mxu1 %v2979_v21  ;;  %v3040_v21 = vld [vmem:[#allocation6 + $0x428] ss:$16 sps:$4 sm:$0xff]  }
  0xd7   :  { %1625 = vmatpush1.bf16.msra.mxu0 %v2976_v20  ;;  %1712 = vmatprep.subr.bf16.mxu1 %v2987_v4  ;;  %v3138_v20 = vld [vmem:[#allocation9 + $0x94] ss:$8 sps:$4 sm:$0xff]   ;;  %v3136_v4 = vld [vmem:[#allocation9 + $0x90] ss:$8 sps:$4 sm:$0xff]  }
  0xd8   :  { %1626 = vmatprep.subr.bf16.mxu0 %v2984_v22  ;;  %v3045_v22 = vld [vmem:[#allocation6 + $0x44c] ss:$16 sps:$4 sm:$0xff]  }
  0xda   :  { %1713 = vmatpush1.bf16.msra.mxu1 %v2985_v24  ;;  %v3043_v24 = vld [vmem:[#allocation6 + $0x448] ss:$16 sps:$4 sm:$0xff]  }
  0xdb   :  { %1627 = vmatpush1.bf16.msra.mxu0 %v2982_v23  ;;  %1714 = vmatprep.subr.bf16.mxu1 %v2993_v26  ;;  %v3141_v23 = vld [vmem:[#allocation9 + $0xa4] ss:$8 sps:$4 sm:$0xff]   ;;  %v3139_v26 = vld [vmem:[#allocation9 + $0xa0] ss:$8 sps:$4 sm:$0xff]  }
  0xdc   :  { %1628 = vmatprep.subr.bf16.mxu0 %v2990_v25  ;;  %v3048_v25 = vld [vmem:[#allocation6 + $0x46c] ss:$16 sps:$4 sm:$0xff]  }
  0xde   :  { %1715 = vmatpush1.bf16.msra.mxu1 %v2991_v51  ;;  %v3051_v51 = vld [vmem:[#allocation6 + $0x48c] ss:$16 sps:$4 sm:$0xff]  }
  0xdf   :  { %1629 = vmatpush1.bf16.msra.mxu0 %v2988_v27  ;;  %1716 = vmatprep.subr.bf16.mxu1 %v2999_v29  ;;  %v3046_v27 = vld [vmem:[#allocation6 + $0x468] ss:$16 sps:$4 sm:$0xff]  }
  0xe0   :  { %1630 = vmatprep.subr.bf16.mxu0 %v2996_v28  ;;  %v3147_v28 = vld [vmem:[#allocation9 + $0xc4] ss:$8 sps:$4 sm:$0xff]  }
  0xe1   :  { %v3049_v29 = vld [vmem:[#allocation6 + $0x488] ss:$16 sps:$4 sm:$0xff]  }
  0xe2   :  { %1717 = vmatpush1.bf16.msra.mxu1 %v2997_v31  ;;  %v3145_v31 = vld [vmem:[#allocation9 + $0xc0] ss:$8 sps:$4 sm:$0xff]  }
  0xe3   :  { %1631 = vmatpush1.bf16.msra.mxu0 %v2994_v30  ;;  %1718 = vmatprep.subr.bf16.mxu1 %v3005_v33  ;;  %v3054_v30 = vld [vmem:[#allocation6 + $0x4ac] ss:$16 sps:$4 sm:$0xff]   ;;  %v3052_v33 = vld [vmem:[#allocation6 + $0x4a8] ss:$16 sps:$4 sm:$0xff]  }
  0xe4   :  { %1632 = vmatprep.subr.bf16.mxu0 %v3002_v32  ;;  %v3150_v32 = vld [vmem:[#allocation9 + $0xd4] ss:$8 sps:$4 sm:$0xff]  }
  0xe6   :  { %1719 = vmatpush1.bf16.msra.mxu1 %v3003_v36  ;;  %v3148_v36 = vld [vmem:[#allocation9 + $0xd0] ss:$8 sps:$4 sm:$0xff]  }
  0xe7   :  { %1633 = vmatpush1.bf16.msra.mxu0 %v3000_v35  ;;  %1720 = vmatprep.subr.bf16.mxu1 %v3011_v38  ;;  %v3057_v35 = vld [vmem:[#allocation6 + $0x4cc] ss:$16 sps:$4 sm:$0xff]  }
  0xe8   :  { %1634 = vmatprep.subr.bf16.mxu0 %v3008_v37  ;;  %v3055_v37 = vld [vmem:[#allocation6 + $0x4c8] ss:$16 sps:$4 sm:$0xff]   ;;  %v3060_v38 = vld [vmem:[#allocation6 + $0x4ec] ss:$16 sps:$4 sm:$0xff]  }
  0xea   :  { %1721 = vmatpush1.bf16.msra.mxu1 %v3009_v40  ;;  %v3063_v40 = vld [vmem:[#allocation6 + $0x50c] ss:$16 sps:$4 sm:$0xff]  }
  0xeb   :  { %1635 = vmatpush1.bf16.msra.mxu0 %v3006_v39  ;;  %1722 = vmatprep.subr.bf16.mxu1 %v3015_v41  ;;  %v3058_v39 = vld [vmem:[#allocation6 + $0x4e8] ss:$16 sps:$4 sm:$0xff]  }
  0xec   :  { %2243 = vmatprep.subr.bf16.mxu0 %v3111_v46  ;;  %v3061_v41 = vld [vmem:[#allocation6 + $0x508] ss:$16 sps:$4 sm:$0xff]  }
  0xed   :  { %v3067_v46 = vld [vmem:[#allocation6 + $0x548] ss:$16 sps:$4 sm:$0xff]  }
  0xee   :  { %1653 = vmatmul.mubr.bf16.vlgmr.msra.gmra.mrb[0].mxu0 %v3468_v42  ;;  %1723 = vmatpush1.bf16.msra.mxu1 %v3013_v43  ;;  %v3066_v43 = vld [vmem:[#allocation6 + $0x52c] ss:$16 sps:$4 sm:$0xff]  }
  0xef   :  { %1724 = vmatprep.subr.bf16.mxu1 %v3018_v44  ;;  %2244 = vmatpush1.bf16.msra.mxu0 %v3109_v45  ;;  %v3064_v44 = vld [vmem:[#allocation6 + $0x528] ss:$16 sps:$4 sm:$0xff]   ;;  %v3069_v45 = vld [vmem:[#allocation6 + $0x54c] ss:$16 sps:$4 sm:$0xff]  }
  0xf0   :  { %2245 = vmatprep.subr.bf16.mxu0 %v3114_v48  ;;  %v3070_v48 = vld [vmem:[#allocation6 + $0x568] ss:$16 sps:$4 sm:$0xff]  }
  0xf2   :  { %1725 = vmatpush1.bf16.msra.mxu1 %v3016_v47  ;;  %v3072_v47 = vld [vmem:[#allocation6 + $0x56c] ss:$16 sps:$4 sm:$0xff]  }
  0xf3   :  { %1726 = vmatprep.subr.bf16.mxu1 %v3021_v49  ;;  %2246 = vmatpush1.bf16.msra.mxu0 %v3112_v50  ;;  %v3075_v49 = vld [vmem:[#allocation6 + $0x58c] ss:$16 sps:$4 sm:$0xff]   ;;  %v3073_v50 = vld [vmem:[#allocation6 + $0x588] ss:$16 sps:$4 sm:$0xff]  }
  0xf4   :  { %2247 = vmatprep.subr.bf16.mxu0 %v3117_v52  ;;  %v3078_v52 = vld [vmem:[#allocation6 + $0x5ac] ss:$16 sps:$4 sm:$0xff]  }
  0xf6   :  { %1727 = vmatpush1.bf16.msra.mxu1 %v3019_v53  ;;  %v3076_v53 = vld [vmem:[#allocation6 + $0x5a8] ss:$16 sps:$4 sm:$0xff]  }
  0xf7   :  { %1728 = vmatprep.subr.bf16.mxu1 %v3024_v54  ;;  %2248 = vmatpush1.bf16.msra.mxu0 %v3115_v56  ;;  %v3081_v54 = vld [vmem:[#allocation6 + $0x5cc] ss:$16 sps:$4 sm:$0xff]   ;;  %v3079_v56 = vld [vmem:[#allocation6 + $0x5c8] ss:$16 sps:$4 sm:$0xff]  }
  0xf8   :  { %2249 = vmatprep.subr.bf16.mxu0 %v3120_v58  ;;  %v3084_v58 = vld [vmem:[#allocation6 + $0x5ec] ss:$16 sps:$4 sm:$0xff]  }
  0xfa   :  { %1729 = vmatpush1.bf16.msra.mxu1 %v3022_v55  ;;  %v3153_v55 = vld [vmem:[#allocation9 + $0xe4] ss:$8 sps:$4 sm:$0xff]  }
  0xfb   :  { %1730 = vmatprep.subr.bf16.mxu1 %v3027_v57  ;;  %2250 = vmatpush1.bf16.msra.mxu0 %v3118_v59  ;;  %v3151_v57 = vld [vmem:[#allocation9 + $0xe0] ss:$8 sps:$4 sm:$0xff]   ;;  %v3156_v59 = vld [vmem:[#allocation9 + $0xf4] ss:$8 sps:$4 sm:$0xff]  }
  0xfc   :  { %2251 = vmatprep.subr.bf16.mxu0 %v3123_v60  ;;  %v3082_v60 = vld [vmem:[#allocation6 + $0x5e8] ss:$16 sps:$4 sm:$0xff]  }
  0xfe   :  { %1731 = vmatpush1.bf16.msra.mxu1 %v3025_v61  ;;  %v3154_v61 = vld [vmem:[#allocation9 + $0xf0] ss:$8 sps:$4 sm:$0xff]  }
  0xff   :  { %1732 = vmatprep.subr.bf16.mxu1 %v3030_v62  ;;  %2252 = vmatpush1.bf16.msra.mxu0 %v3121_v63  ;;  %v3087_v62 = vld [vmem:[#allocation6 + $0x60c] ss:$16 sps:$4 sm:$0xff]   ;;  %v3085_v63 = vld [vmem:[#allocation6 + $0x608] ss:$16 sps:$4 sm:$0xff]  }
 0x100   :  { %2253 = vmatprep.subr.bf16.mxu0 %v3126_v0  ;;  %v3090_v0 = vld [vmem:[#allocation6 + $0x62c] ss:$16 sps:$4 sm:$0xff]  }
 0x102   :  { %1733 = vmatpush1.bf16.msra.mxu1 %v3028_v1  ;;  %v3159_v1 = vld [vmem:[#allocation9 + $0x104] ss:$8 sps:$4 sm:$0xff]  }
 0x103   :  { %1734 = vmatprep.subr.bf16.mxu1 %v3033_v2  ;;  %2254 = vmatpush1.bf16.msra.mxu0 %v3124_v3  ;;  %v3088_v2 = vld [vmem:[#allocation6 + $0x628] ss:$16 sps:$4 sm:$0xff]   ;;  %v3093_v3 = vld [vmem:[#allocation6 + $0x64c] ss:$16 sps:$4 sm:$0xff]  }
 0x104   :  { %2255 = vmatprep.subr.bf16.mxu0 %v3129_v6  ;;  %v3091_v6 = vld [vmem:[#allocation6 + $0x648] ss:$16 sps:$4 sm:$0xff]  }
 0x106   :  { %1735 = vmatpush1.bf16.msra.mxu1 %v3031_v7  ;;  %v3096_v7 = vld [vmem:[#allocation6 + $0x66c] ss:$16 sps:$4 sm:$0xff]  }
 0x107   :  { %1736 = vmatprep.subr.bf16.mxu1 %v3036_v8  ;;  %2256 = vmatpush1.bf16.msra.mxu0 %v3127_v9  ;;  %v3094_v8 = vld [vmem:[#allocation6 + $0x668] ss:$16 sps:$4 sm:$0xff]   ;;  %v3099_v9 = vld [vmem:[#allocation6 + $0x68c] ss:$16 sps:$4 sm:$0xff]  }
 0x108   :  { %2257 = vmatprep.subr.bf16.mxu0 %v3132_v11  ;;  %v3097_v11 = vld [vmem:[#allocation6 + $0x688] ss:$16 sps:$4 sm:$0xff]  }
 0x10a   :  { %1737 = vmatpush1.bf16.msra.mxu1 %v3034_v12  ;;  %v3102_v12 = vld [vmem:[#allocation6 + $0x6ac] ss:$16 sps:$4 sm:$0xff]  }
 0x10b   :  { %1749 = vmatprep.subr.bf16.mxu1 %v3039_v13  ;;  %2258 = vmatpush1.bf16.msra.mxu0 %v3130_v14  ;;  %v3105_v13 = vld [vmem:[#allocation6 + $0x6cc] ss:$16 sps:$4 sm:$0xff]  }
 0x10c   :  { %2259 = vmatprep.subr.bf16.mxu0 %v3135_v15 }
 0x10d   :  { %1739 = vmatmul.mubr.bf16.vlgmr.msra.gmra.mrb[4].mxu1 %v3455_v5  ;;  %v3144_v5 = vld [vmem:[#allocation9 + $0xb4] ss:$8 sps:$4 sm:$0xff]  }
 0x10e   :  { %1750 = vmatpush1.bf16.msra.mxu1 %v3037_v16  ;;  %1781 = vmatprep.mubr.bf16.mxu1 %v3459_v34  ;;  %v3142_v34 = vld [vmem:[#allocation9 + $0xb0] ss:$8 sps:$4 sm:$0xff]   ;;  %v3103_v16 = vld [vmem:[#allocation6 + $0x6c8] ss:$16 sps:$4 sm:$0xff]  }
 0x10f   :  { %1751 = vmatprep.subr.bf16.mxu1 %v3042_v17  ;;  %2260 = vmatpush1.bf16.msra.mxu0 %v3133_v18  ;;  %v3108_v18 = vld [vmem:[#allocation6 + $0x6ec] ss:$16 sps:$4 sm:$0xff]  }
 0x110   :  { %2261 = vmatprep.subr.bf16.mxu0 %v3138_v20  ;;  %v3106_v20 = vld [vmem:[#allocation6 + $0x6e8] ss:$16 sps:$4 sm:$0xff]  }
 0x112   :  { %1752 = vmatpush1.bf16.msra.mxu1 %v3040_v21  ;;  %v315_v21 = vlaneseq }
 0x113   :  { %1753 = vmatprep.subr.bf16.mxu1 %v3045_v22  ;;  %2262 = vmatpush1.bf16.msra.mxu0 %v3136_v4 }
 0x114   :  { %2263 = vmatprep.subr.bf16.mxu0 %v3141_v23  ;;  %v3477_v22 = vshrl.u32 %v315_v21, 7  ;;  %v3480_v23 = vld [vmem:[#allocation8] sm:$0xf] }
 0x116   :  { %1754 = vmatpush1.bf16.msra.mxu1 %v3043_v24  ;;  %v317_v4 = vsub.s32 0, %v3477_v22  ;;  %v321_v24 = vsub.s32 1, %v3477_v22 }
 0x117   :  { %1755 = vmatprep.subr.bf16.mxu1 %v3048_v25  ;;  %2264 = vmatpush1.bf16.msra.mxu0 %v3139_v26 }
 0x118   :  { %2265 = vmatprep.subr.bf16.mxu0 %v3144_v5  ;;  %v318_v25 = vrot.slane %v3480_v23, %v317_v4  ;;  %v322_v26 = vrot.slane %v3480_v23, %v321_v24 }
 0x11a   :  { %1756 = vmatpush1.bf16.msra.mxu1 %v3046_v27 }
 0x11b   :  { %1757 = vmatprep.subr.bf16.mxu1 %v3051_v51  ;;  %2266 = vmatpush1.bf16.msra.mxu0 %v3142_v34 }
 0x11c   :  { %2267 = vmatprep.subr.bf16.mxu0 %v3147_v28 }
 0x11e   :  { %1758 = vmatpush1.bf16.msra.mxu1 %v3049_v29 }
 0x11f   :  { %1759 = vmatprep.subr.bf16.mxu1 %v3054_v30  ;;  %2268 = vmatpush1.bf16.msra.mxu0 %v3145_v31 }
 0x120   :  { %2269 = vmatprep.subr.bf16.mxu0 %v3150_v32 }
 0x122   :  { %1760 = vmatpush1.bf16.msra.mxu1 %v3052_v33 }
 0x123   :  { %1761 = vmatprep.subr.bf16.mxu1 %v3057_v35  ;;  %2270 = vmatpush1.bf16.msra.mxu0 %v3148_v36 }
 0x124   :  { %2271 = vmatprep.subr.bf16.mxu0 %v3153_v55  ;;  %v3177_v55 = vld [vmem:[#allocation9 + $0x164] ss:$8 sps:$4 sm:$0xff]  }
 0x126   :  { %1762 = vmatpush1.bf16.msra.mxu1 %v3055_v37 }
 0x127   :  { %1763 = vmatprep.subr.bf16.mxu1 %v3060_v38  ;;  %2272 = vmatpush1.bf16.msra.mxu0 %v3151_v57  ;;  %v3180_v57 = vld [vmem:[#allocation9 + $0x174] ss:$8 sps:$4 sm:$0xff]  }
 0x128   :  { %2273 = vmatprep.subr.bf16.mxu0 %v3156_v59  ;;  %v3183_v59 = vld [vmem:[#allocation9 + $0x184] ss:$8 sps:$4 sm:$0xff]  }
 0x12a   :  { %1764 = vmatpush1.bf16.msra.mxu1 %v3058_v39 }
 0x12b   :  { %1765 = vmatprep.subr.bf16.mxu1 %v3063_v40  ;;  %2274 = vmatpush1.bf16.msra.mxu0 %v3154_v61  ;;  %v3186_v61 = vld [vmem:[#allocation9 + $0x194] ss:$8 sps:$4 sm:$0xff]  }
 0x12c   :  { %2286 = vmatprep.subr.bf16.mxu0 %v3159_v1  ;;  %v3192_v1 = vld [vmem:[#allocation9 + $0x1b4] ss:$8 sps:$4 sm:$0xff]  }
 0x12e   :  { %1766 = vmatpush1.bf16.msra.mxu1 %v3061_v41 }
 0x12f   :  { %1767 = vmatprep.subr.bf16.mxu1 %v3066_v43  ;;  %v3157_v43 = vld [vmem:[#allocation9 + $0x100] ss:$8 sps:$4 sm:$0xff]  }
 0x132   :  { %1768 = vmatpush1.bf16.msra.mxu1 %v3064_v44  ;;  %v3162_v44 = vld [vmem:[#allocation9 + $0x114] ss:$8 sps:$4 sm:$0xff]  }
 0x133   :  { %1769 = vmatprep.subr.bf16.mxu1 %v3069_v45  ;;  %v3160_v45 = vld [vmem:[#allocation9 + $0x110] ss:$8 sps:$4 sm:$0xff]  }
 0x136   :  { %1770 = vmatpush1.bf16.msra.mxu1 %v3067_v46  ;;  %v3165_v46 = vld [vmem:[#allocation9 + $0x124] ss:$8 sps:$4 sm:$0xff]  }
 0x137   :  { %1771 = vmatprep.subr.bf16.mxu1 %v3072_v47  ;;  %v3163_v47 = vld [vmem:[#allocation9 + $0x120] ss:$8 sps:$4 sm:$0xff]  }
 0x13a   :  { %1772 = vmatpush1.bf16.msra.mxu1 %v3070_v48  ;;  %v3168_v48 = vld [vmem:[#allocation9 + $0x134] ss:$8 sps:$4 sm:$0xff]  }
 0x13b   :  { %1773 = vmatprep.subr.bf16.mxu1 %v3075_v49  ;;  %v3166_v49 = vld [vmem:[#allocation9 + $0x130] ss:$8 sps:$4 sm:$0xff]  }
 0x13e   :  { %1774 = vmatpush1.bf16.msra.mxu1 %v3073_v50  ;;  %v3171_v50 = vld [vmem:[#allocation9 + $0x144] ss:$8 sps:$4 sm:$0xff]  }
 0x13f   :  { %1775 = vmatprep.subr.bf16.mxu1 %v3078_v52  ;;  %v3169_v52 = vld [vmem:[#allocation9 + $0x140] ss:$8 sps:$4 sm:$0xff]  }
 0x142   :  { %1776 = vmatpush1.bf16.msra.mxu1 %v3076_v53  ;;  %v3174_v53 = vld [vmem:[#allocation9 + $0x154] ss:$8 sps:$4 sm:$0xff]  }
 0x143   :  { %1777 = vmatprep.subr.bf16.mxu1 %v3081_v54  ;;  %v3172_v54 = vld [vmem:[#allocation9 + $0x150] ss:$8 sps:$4 sm:$0xff]  }
 0x146   :  { %1778 = vmatpush1.bf16.msra.mxu1 %v3079_v56  ;;  %v3175_v56 = vld [vmem:[#allocation9 + $0x160] ss:$8 sps:$4 sm:$0xff]  }
 0x147   :  { %1779 = vmatprep.subr.bf16.mxu1 %v3084_v58  ;;  %v3178_v58 = vld [vmem:[#allocation9 + $0x170] ss:$8 sps:$4 sm:$0xff]  }
 0x14a   :  { %1780 = vmatpush1.bf16.msra.mxu1 %v3082_v60  ;;  %v3181_v60 = vld [vmem:[#allocation9 + $0x180] ss:$8 sps:$4 sm:$0xff]  }
 0x14b   :  { %1792 = vmatprep.subr.bf16.mxu1 %v3087_v62  ;;  %v3184_v62 = vld [vmem:[#allocation9 + $0x190] ss:$8 sps:$4 sm:$0xff]  }
 0x14d   :  { %1782 = vmatmul.mubr.bf16.vlgmr.msra.gmra.mrb[4].mxu1 %v3462_v10  ;;  %v3100_v10 = vld [vmem:[#allocation6 + $0x6a8] ss:$16 sps:$4 sm:$0xff]  }
 0x14e   :  { %1793 = vmatpush1.bf16.msra.mxu1 %v3085_v63  ;;  %1824 = vmatprep.mubr.bf16.mxu1 %v3349_v19  ;;  %v3189_v63 = vld [vmem:[#allocation9 + $0x1a4] ss:$8 sps:$4 sm:$0xff]  }
 0x14f   :  { %1794 = vmatprep.subr.bf16.mxu1 %v3090_v0  ;;  %v3187_v0 = vld [vmem:[#allocation9 + $0x1a0] ss:$8 sps:$4 sm:$0xff]  }
 0x152   :  { %1795 = vmatpush1.bf16.msra.mxu1 %v3088_v2  ;;  %v3190_v2 = vld [vmem:[#allocation9 + $0x1b0] ss:$8 sps:$4 sm:$0xff]  }
 0x153   :  { %1796 = vmatprep.subr.bf16.mxu1 %v3093_v3  ;;  %v3195_v3 = vld [vmem:[#allocation9 + $0x1c4] ss:$8 sps:$4 sm:$0xff]  }
 0x156   :  { %1797 = vmatpush1.bf16.msra.mxu1 %v3091_v6  ;;  %v3193_v6 = vld [vmem:[#allocation9 + $0x1c0] ss:$8 sps:$4 sm:$0xff]  }
 0x157   :  { %1798 = vmatprep.subr.bf16.mxu1 %v3096_v7  ;;  %v3198_v7 = vld [vmem:[#allocation9 + $0x1d4] ss:$8 sps:$4 sm:$0xff]  }
 0x15a   :  { %1799 = vmatpush1.bf16.msra.mxu1 %v3094_v8  ;;  %v3196_v8 = vld [vmem:[#allocation9 + $0x1d0] ss:$8 sps:$4 sm:$0xff]  }
 0x15b   :  { %1800 = vmatprep.subr.bf16.mxu1 %v3099_v9  ;;  %v3201_v9 = vld [vmem:[#allocation9 + $0x1e4] ss:$8 sps:$4 sm:$0xff]  }
 0x15e   :  { %1801 = vmatpush1.bf16.msra.mxu1 %v3097_v11  ;;  %v3199_v11 = vld [vmem:[#allocation9 + $0x1e0] ss:$8 sps:$4 sm:$0xff]  }
 0x15f   :  { %1802 = vmatprep.subr.bf16.mxu1 %v3102_v12  ;;  %v3204_v12 = vld [vmem:[#allocation9 + $0x1f4] ss:$8 sps:$4 sm:$0xff]  }
 0x160   :  { %v1525_v14 = vpop.f32.mrb[0].mxu1 }
 0x161   :  { %v1527_v19 = vpop.f32.mrb[1].mxu1  ;;  %v1526_v5 = vadd.f32 %v1525_v14, %v318_v25  ;;  %v329_v14 = vsub.s32 3, %v3477_v22 }
 0x162   :  { %v1529_v15 = vpop.f32.mrb[2].mxu1  ;;  %1803 = vmatpush1.bf16.msra.mxu1 %v3100_v10  ;;  %v3202_v10 = vld [vmem:[#allocation9 + $0x1f0] ss:$8 sps:$4 sm:$0xff]  }
 0x163   :  { %v1531_v17 = vpop.f32.mrb[3].mxu1  ;;  %1804 = vmatprep.subr.bf16.mxu1 %v3105_v13  ;;  %v1530_v51 = vadd.f32 %v1529_v15, %v318_v25  ;;  %v325_v13 = vsub.s32 2, %v3477_v22  ;;  %v330_v15 = vrot.slane %v3480_v23, %v329_v14 }
 0x164   :  { %v1532_v29 = vadd.f32 %v1531_v17, %v322_v26 }
 0x166   :  { %1805 = vmatpush1.bf16.msra.mxu1 %v3103_v16 }
 0x167   :  { %1806 = vmatprep.subr.bf16.mxu1 %v3108_v18 }
 0x16a   :  { %1807 = vmatpush1.bf16.msra.mxu1 %v3106_v20 }
 0x16d   :  { %1825 = vmatmul.mubr.bf16.vlgmr.msra.gmra.mrb[4].mxu1 %v3468_v42  ;;  %v1528_v42 = vadd.f32 %v1527_v19, %v322_v26  ;;  %v326_v19 = vrot.slane %v3480_v23, %v325_v13  ;;  %v1911_v23 = vld [vmem:[%s3538_s4] sm:$0x3] }
 0x1c1   :  { %v1654_v27 = vpop.f32.mrb[0].mxu0 }
 0x1c2   :  { %v2709_v34 = vadd.f32 %v1654_v27, %v1526_v5  ;;  %v1656_v28 = vpop.f32.mrb[1].mxu0 }
 0x1c3   :  { %v2711_v30 = vadd.f32 %v1656_v28, %v1528_v42  ;;  %v1658_v31 = vpop.f32.mrb[2].mxu0 }
 0x1c4   :  { %v2713_v32 = vadd.f32 %v1658_v31, %v1530_v51  ;;  %v1660_v33 = vpop.f32.mrb[3].mxu0  ;;  %v1835_v36 = vmax.f32 %v2709_v34, 0.0  ;;  %v1920_v31 = vrot.slane %v1911_v23, %v321_v24  ;;  %v2334_v24 = vld [vmem:[%s3539_s5 + $0x8] sm:$0xff] }
 0x1c5   :  { %v2715_v35 = vadd.f32 %v1660_v33, %v1532_v29  ;;  %v1836_v38 = vmax.f32 %v2711_v30, 0.0 }
 0x1c6   :  { %v1839_v37 = vmax.f32 %v2713_v32, 0.0 }
 0x1c7   :  { %v1840_v39 = vmax.f32 %v2715_v35, 0.0 }
 0x1c8   :  { %v1843_v40 = vpack.c.bf16 %v1839_v37, %v1835_v36 }
 0x1c9   :  { %v1844_v41 = vpack.c.bf16 %v1840_v39, %v1836_v38 }
 0x1cb   :  { %2275 = vmatprep.mubr.bf16.mxu0 %v1844_v41  ;;  %v1916_v41 = vrot.slane %v1911_v23, %v317_v4 }
 0x1cc   :  { %2276 = vmatmul.mubr.bf16.vlgmr.msra.gmra.mrb[4].mxu0 %v1843_v40 }
 0x1cd   :  { %2287 = vmatpush1.bf16.msra.mxu0 %v3157_v43 }
 0x1ce   :  { %2288 = vmatprep.subr.bf16.mxu0 %v3162_v44  ;;  %v2333_v44 = vld [vmem:[%s3539_s5] sm:$0xff]  ;;  %s2384_s5 = sshll.u32 %s3350_s9, 4  ;;  %s2385_s5 = int_to_ptr.vmem [resolvable:$true] %s2384_s5 }
 0x1cf   :  { %s3297_s10 = scalar_lea.vmem %s2385_s5, 256  ;;  %p3302_p5 = scmp.lt.s32.totalorder %s2385_s5, %s2385_s5 }
 0x1d0   :  { %p3298_p4 = scmp.ne.s32.totalorder %s2385_s5, %s3297_s10  ;;  %p3303_p6 = scmp.lt.s32.totalorder %s3297_s10, %s3297_s10 }
 0x1d1   :  { %2289 = vmatpush1.bf16.msra.mxu0 %v3160_v45 }
 0x1d2   :  { %2290 = vmatprep.subr.bf16.mxu0 %v3165_v46  ;;  %p3304_p7 = por %p3303_p6, %p3302_p5 }
 0x1d4   :  { %p3305_p8 = pnand %p3304_p7, %p3298_p4 }
 0x1d5   :  { %2291 = vmatpush1.bf16.msra.mxu0 %v3163_v47 }
 0x1d6   :  { %2292 = vmatprep.subr.bf16.mxu0 %v3168_v48 }
 0x1d9   :  { %2293 = vmatpush1.bf16.msra.mxu0 %v3166_v49 }
 0x1da   :  { %2294 = vmatprep.subr.bf16.mxu0 %v3171_v50  ;;  %v2342_v50 = vand.u32 127, %v315_v21 }
 0x1dc   :  { %vm2350_vm0 = vcmp.lt.s32.totalorder %v2342_v50, 2 }
 0x1dd   :  { %2295 = vmatpush1.bf16.msra.mxu0 %v3169_v52 }
 0x1de   :  { %2296 = vmatprep.subr.bf16.mxu0 %v3174_v53 }
 0x1e1   :  { %2297 = vmatpush1.bf16.msra.mxu0 %v3172_v54 }
 0x1e2   :  { %2298 = vmatprep.subr.bf16.mxu0 %v3177_v55 }
 0x1e5   :  { %2299 = vmatpush1.bf16.msra.mxu0 %v3175_v56 }
 0x1e6   :  { %2300 = vmatprep.subr.bf16.mxu0 %v3180_v57 }
 0x1e9   :  { %2301 = vmatpush1.bf16.msra.mxu0 %v3178_v58 }
 0x1ea   :  { %2302 = vmatprep.subr.bf16.mxu0 %v3183_v59 }
 0x1ed   :  { %2303 = vmatpush1.bf16.msra.mxu0 %v3181_v60 }
 0x1ee   :  { %2304 = vmatprep.subr.bf16.mxu0 %v3186_v61 }
 0x1f1   :  { %2305 = vmatpush1.bf16.msra.mxu0 %v3184_v62 }
 0x1f2   :  { %2306 = vmatprep.subr.bf16.mxu0 %v3189_v63 }
 0x1f5   :  { %2307 = vmatpush1.bf16.msra.mxu0 %v3187_v0 }
 0x1f6   :  { %2308 = vmatprep.subr.bf16.mxu0 %v3192_v1 }
 0x1f9   :  { %2309 = vmatpush1.bf16.msra.mxu0 %v3190_v2 }
 0x1fa   :  { %2310 = vmatprep.subr.bf16.mxu0 %v3195_v3 }
 0x1fd   :  { %2311 = vmatpush1.bf16.msra.mxu0 %v3193_v6 }
 0x1fe   :  { %2312 = vmatprep.subr.bf16.mxu0 %v3198_v7 }
 0x201   :  { %2313 = vmatpush1.bf16.msra.mxu0 %v3196_v8 }
 0x202   :  { %2314 = vmatprep.subr.bf16.mxu0 %v3201_v9 }
 0x205   :  { %2315 = vmatpush1.bf16.msra.mxu0 %v3199_v11 }
 0x206   :  { %2316 = vmatprep.subr.bf16.mxu0 %v3204_v12 }
 0x209   :  { %2317 = vmatpush1.bf16.msra.mxu0 %v3202_v10 }
 0x240   :  { %v1826_v16 = vpop.f32.mrb[4].mxu1 }
 0x241   :  { %v2716_v17 = vadd.f32 %v1826_v16, %v326_v19  ;;  %v1828_v18 = vpop.f32.mrb[5].mxu1 }
 0x242   :  { %v2717_v20 = vadd.f32 %v1828_v18, %v330_v15  ;;  %v1830_v25 = vpop.f32.mrb[6].mxu1 }
 0x243   :  { %v2718_v26 = vadd.f32 %v1830_v25, %v326_v19  ;;  %v1832_v5 = vpop.f32.mrb[7].mxu1  ;;  %v1837_v27 = vmax.f32 %v2716_v17, 0.0 }
 0x244   :  { %v2719_v42 = vadd.f32 %v1832_v5, %v330_v15  ;;  %v1838_v34 = vmax.f32 %v2717_v20, 0.0 }
 0x245   :  { %v1841_v51 = vmax.f32 %v2718_v26, 0.0 }
 0x246   :  { %v1842_v28 = vmax.f32 %v2719_v42, 0.0 }
 0x247   :  { %v1845_v29 = vpack.c.bf16 %v1841_v51, %v1837_v27 }
 0x248   :  { %v1846_v30 = vpack.c.bf16 %v1842_v28, %v1838_v34 }
 0x24a   :  { %2318 = vmatprep.mubr.bf16.mxu0 %v1846_v30 }
 0x24b   :  { %2319 = vmatmul.mubr.bf16.vlgmr.msra.gmra.mrb[4].mxu0 %v1845_v29 }
 0x31e   :  { %v2320_v32 = vpop.f32.mrb[4].mxu0 }
 0x31f   :  { %v2322_v33 = vpop.f32.mrb[5].mxu0  ;;  %v2720_v43 = vadd.f32 %v2320_v32, %v1916_v41 }
 0x320   :  { %v2721_v35 = vadd.f32 %v2322_v33, %v1920_v31  ;;  %v2324_v36 = vpop.f32.mrb[6].mxu0 }
 0x321   :  { %v2326_v37 = vpop.f32.mrb[7].mxu0  ;;  %v2357_v46 = vmul.f32 %v2720_v43, %v2720_v43  ;;  %v2722_v52 = vadd.f32 %v2324_v36, %v1916_v41 }
 0x322   :  { %v2329_v38 = vmul.f32 1.442695, %v2721_v35  ;;  %v2723_v39 = vadd.f32 %v2326_v37, %v1920_v31 }
 0x324   :  { %3205 = vpow2.f32 %v2329_v38  ;;  %v2331_v40 = vmul.f32 1.442695, %v2723_v39 }
 0x326   :  { %3207 = vpow2.f32 %v2331_v40 }
 0x32e   :  { %v3206_v45 = vpop.eup %3205 }
 0x32f   :  { %v2355_v47 = vmul.f32 %v3206_v45, %v3206_v45  ;;  %v2335_v48 = vmul.f32 %v3206_v45, %v2333_v44 }
 0x330   :  { %v3208_v49 = vpop.eup %3207 }
 0x331   :  { %v2359_v53 = vadd.f32 %v2357_v46, %v2355_v47  ;;  %v2336_v22 = vmul.f32 %v3208_v49, %v2334_v24  ;;  %v2337_v4 = vadd.f32 %v2720_v43, %v2335_v48 }
 0x333   :  { %v2361_v54 = vsub.f32 %v2359_v53, %v2721_v35  ;;  %v2338_v55 = vadd.f32 %v2722_v52, %v2336_v22  ;;  %2339 = vst [vmem:[#allocation11] sm:$0xff] %v2337_v4 }
 0x335   :  { %v2706_v56 = vadd.f32 -0.5, %v2361_v54  ;;  %2340 = vst [vmem:[#allocation11 + $0x8] sm:$0xff] %v2338_v55 }
 0x337   :  { %v2365_v57 = vsel %vm2350_vm0, %v2706_v56, 0.0 }
 0x338   :  { %2368 = vadd.xlane.f32.xlu0 %v2365_v57 }
 0x339   :  { %3308 = shalt.err (!%p3305_p8)
}
 0x33a   :  { %s3309_s13 = scalar_lea.hbm %s3540_s6, 256 }
 0x33b   :  { %p3310_p9 = scmp.ne.s32.totalorder %s3540_s6, %s3309_s13  ;;  %p3313_p10 = scmp.lt.u32.totalorder %s3309_s13, %s3540_s6 }
 0x33d   :  { %p3315_p11 = pnand %p3313_p10, %p3310_p9 }
 0x33f   :  { %3318 = shalt.err (!%p3315_p11)
}
 0x340   :  { %2390 = dma.vmem_to_hbm [thread:$0]  %s2385_s5, 256, %s3540_s6, [#allocation4], %s3347_s2, %s3347_s2, %s3348_s25  }
 0x341   :  { %s3319_s22 = scalar_lea.hbm %s3541_s7, 16 }
 0x342   :  { %p3320_p12 = scmp.ne.s32.totalorder %s3541_s7, %s3319_s22  ;;  %p3323_p13 = scmp.lt.u32.totalorder %s3319_s22, %s3541_s7 }
 0x344   :  { %p3325_p0 = pnand %p3323_p13, %p3320_p12 }
 0x3c5   :  { %v2369_v21 = vpop.xlane.xlu0 %2368 }
 0x3c6   :  { %v2370_v58 = vrot.slane %v2369_v21, 4 }
 0x3c8   :  { %v2371_v59 = vadd.f32 %v2370_v58, %v2369_v21 }
 0x3ca   :  { %v2372_v60 = vrot.slane %v2371_v59, 2 }
 0x3cc   :  { %v2373_v61 = vadd.f32 %v2372_v60, %v2371_v59 }
 0x3ce   :  { %v2374_v62 = vrot.slane %v2373_v61, 1 }
 0x3d0   :  { %v2375_v63 = vadd.f32 %v2374_v62, %v2373_v61 }
 0x3d2   :  { %2748 = vpush %v2375_v63 }
 0x403   :  { %s2749_s19 = spop %2748 }
 0x404   :  { %2378 = sst [smem:[#allocation12]] %s2749_s19 }
 0x405   :  { %3328 = shalt.err (!%p3325_p0)
}
 0x406   :  { %s3351_s2 = smov [#allocation12]  }
 0x407   :  { %2398 = dma.smem_to_hbm %s3351_s2, 16, %s3541_s7, [#allocation5]  }
 0x408   :  { %3335 = dma.done.wait [#allocation4], 256  }
 0x409   :  { %3336 = vsyncadd [#allocation4], 4294967040 }
 0x40a   :  { %3337 = dma.done.wait [#allocation5], 16  }
 0x40b   :  { %3338 = vsyncadd [#allocation5], 4294967280 }
 0x40c   :  { %2405 = sfence }
 0x40d   :  { %2406 = vsyncpa [#allocation3], 1 }
 0x40e   :  { %2407 = vsyncpa [#allocation7], 1 }
 0x40f   :  { %2408 = vsyncpa [#allocation10], 1 }
 0x410   :  { %2409 = vsyncpa [#allocation4], 1 }
 0x411   :  { %2410 = vsyncpa [#allocation5], 1 }

</bundles_post_ra>
